<compile_context>
chip_gen: v7x
topology: tpu7x:2x2x1
jax: 0.10.0
libtpu: 0.0.40
codegen_flags: <defaults>
</compile_context>

<pallas_src>
import math
import jax
import jax.numpy as jnp
from jax.experimental import pallas as pl
from jax.experimental.pallas import tpu as pltpu

# ---- small, deterministic hyperparameters (consistent with TransformerLM.__init__) ----
N_INPUT_TOKENS = 10
STATE_SIZE = 32                      # d_model
FF_MULT = 1.0
DIM_FF = int(FF_MULT * STATE_SIZE)   # dim_feedforward
NUM_HEADS = 4
HEAD_DIM = STATE_SIZE // NUM_HEADS
NUM_LAYERS = 2
MAX_LEN = 64
VOCAB = N_INPUT_TOKENS + 1 + 1       # +1 eos, +1 sos (encoder_sos=True)
VOCAB_PAD = 128                      # lane-dense padded vocab for the kernel output tile
QKV_PAD = 128                        # lane-dense padded fused-QKV width (3*D = 96 real)
BATCH = 2
SEQ = 8
ROWS = BATCH * SEQ                   # batch folded onto sublanes: one kernel invocation
LN_EPS = 1e-5
NEG_INF = -1e9

WEIGHT_ORDER = ["wqkv", "bqkv", "wo", "bo", "ln1g", "ln1b",
                "w1", "b1", "w2", "b2", "ln2g", "ln2b",
                "wout_pad", "bout_pad"]


def _layer_norm(x, g, b):
    # two-pass version (reference path)
    mu = jnp.mean(x, axis=-1, keepdims=True)
    var = jnp.mean(jnp.square(x - mu), axis=-1, keepdims=True)
    return (x - mu) * jax.lax.rsqrt(var + LN_EPS) * g + b


def transformer_lm_kernel(x_ref, bias_ref,
                          wqkv_ref, bqkv_ref, wo_ref, bo_ref,
                          ln1g_ref, ln1b_ref, w1_ref, b1_ref,
                          w2_ref, b2_ref, ln2g_ref, ln2b_ref,
                          wout_ref, bout_ref,
                          out_ref):
    x = x_ref[...]        # (R, D)   R = BATCH * SEQ (batch rows folded on sublanes)
    bias = bias_ref[...]  # (R, R)   block-diagonal additive bias (causal + length mask)
    D = STATE_SIZE

    def _ln(y, g, b):
        # single-pass layernorm: one XLU reduction pair, var = E[y^2] - mu^2
        mu = jnp.mean(y, axis=-1, keepdims=True)
        ex2 = jnp.mean(y * y, axis=-1, keepdims=True)
        var = ex2 - mu * mu
        return (y - mu) * jax.lax.rsqrt(var + LN_EPS) * g + b

    # Per-head lane masks (static constants, hoisted out of all loops).  Multiplying by a
    # (1, D) mask keeps every matmul full-width on the lane axis: no per-head lane slices,
    # no lane-axis concatenation, hence no XLU relayouts at head_dim=8.
    lane = jax.lax.broadcasted_iota(jnp.int32, (1, D), 1)
    head_masks = [
        ((lane >= h * HEAD_DIM) & (lane < (h + 1) * HEAD_DIM)).astype(jnp.float32)
        for h in range(NUM_HEADS)
    ]

    for l in range(NUM_LAYERS):          # static unroll over layers
        # Fused QKV: one MXU push + one bias add. The q columns of wqkv / bqkv already
        # carry the 1/sqrt(head_dim) scale (folded at init), so no per-head score scale.
        qkv = jnp.dot(x, wqkv_ref[l], preferred_element_type=jnp.float32) + bqkv_ref[l]
        q = qkv[:, 0:D]          # (R, D), pre-scaled
        k = qkv[:, D:2 * D]      # (R, D)
        v = qkv[:, 2 * D:3 * D]  # (R, D)

        ctx = jnp.zeros_like(x)          # accumulated per-head context, (R, D)
        for h in range(NUM_HEADS):       # static unroll over heads
            m = head_masks[h]
            # (q*m) contracted with k over D == q_h @ k_h.T (no explicit transpose needed;
            # last-dim RHS contraction is kept since it lowered cleanly — hoisting k.T would
            # only help if a per-head vxpose showed up in the MLIR).
            s = jax.lax.dot_general(q * m, k, (((1,), (1,)), ((), ())),
                                    preferred_element_type=jnp.float32) + bias
            s = s - jnp.max(s, axis=-1, keepdims=True)
            p = jnp.exp(s)
            p = p * pl.reciprocal(jnp.sum(p, axis=-1, keepdims=True), approx=True)
            # p_h @ (v*m) is nonzero only in head-h columns -> accumulation == concat.
            ctx = ctx + jnp.dot(p, v * m, preferred_element_type=jnp.float32)

        attn = jnp.dot(ctx, wo_ref[l], preferred_element_type=jnp.float32) + bo_ref[l]

        # post-LN encoder layer (residual -> layernorm), ReLU FFN
        x = _ln(x + attn, ln1g_ref[l], ln1b_ref[l])
        h1 = jnp.maximum(
            jnp.dot(x, w1_ref[l], preferred_element_type=jnp.float32) + b1_ref[l], 0.0)
        ff = jnp.dot(h1, w2_ref[l], preferred_element_type=jnp.float32) + b2_ref[l]
        x = _ln(x + ff, ln2g_ref[l], ln2b_ref[l])

    # output_map: Linear(D, V) with V zero-padded to 128 lanes -> unmasked (R, 128) store.
    out_ref[...] = jnp.dot(x, wout_ref[...],
                           preferred_element_type=jnp.float32) + bout_ref[...]


def init_params(key):
    D, F, L, V = STATE_SIZE, DIM_FF, NUM_LAYERS, VOCAB
    ks = jax.random.split(key, 16)

    def xavier(k, shape):
        fan_in, fan_out = shape[-2], shape[-1]
        lim = math.sqrt(6.0 / (fan_in + fan_out))
        return jax.random.uniform(k, shape, jnp.float32, -lim, lim)

    p = {}
    # nn.Embedding default init: N(0, 1)  (embedding_init='pytorch')
    p["embedding"] = jax.random.normal(ks[0], (V, D), jnp.float32)
    # sinusoidal positional encoding (scale_mode='none' -> scale 1.0)
    pos = jnp.arange(MAX_LEN, dtype=jnp.float32)[:, None]
    div = jnp.exp(jnp.arange(0, D, 2, dtype=jnp.float32) * (-math.log(10000.0) / D))
    pe = jnp.zeros((MAX_LEN, D), jnp.float32)
    pe = pe.at[:, 0::2].set(jnp.sin(pos * div))
    pe = pe.at[:, 1::2].set(jnp.cos(pos * div))
    p["pe"] = pe

    p["wq"] = xavier(ks[1], (L, D, D)); p["bq"] = jnp.zeros((L, D), jnp.float32)
    p["wk"] = xavier(ks[2], (L, D, D)); p["bk"] = jnp.zeros((L, D), jnp.float32)
    p["wv"] = xavier(ks[3], (L, D, D)); p["bv"] = jnp.zeros((L, D), jnp.float32)
    p["wo"] = xavier(ks[4], (L, D, D)); p["bo"] = jnp.zeros((L, D), jnp.float32)
    p["ln1g"] = jnp.ones((L, D), jnp.float32); p["ln1b"] = jnp.zeros((L, D), jnp.float32)
    p["w1"] = xavier(ks[5], (L, D, F)); p["b1"] = jnp.zeros((L, F), jnp.float32)
    p["w2"] = xavier(ks[6], (L, F, D)); p["b2"] = jnp.zeros((L, D), jnp.float32)
    p["ln2g"] = jnp.ones((L, D), jnp.float32); p["ln2b"] = jnp.zeros((L, D), jnp.float32)
    # output_map: xavier_uniform (reset_parameters), zero bias
    p["wout"] = xavier(ks[7], (D, V)); p["bout"] = jnp.zeros((1, V), jnp.float32)
    return p


def prepare_kernel_params(p):
    """One-time (init-time) derivation of the fused / padded kernel weights and the
    constant part of the attention bias — nothing here runs per forward call."""
    D, F, L = STATE_SIZE, DIM_FF, NUM_LAYERS
    scale = 1.0 / math.sqrt(HEAD_DIM)

    kp = {}
    kp["embedding"] = p["embedding"]
    kp["pe"] = p["pe"]

    # Fused, lane-dense QKV projection (q columns pre-scaled by 1/sqrt(head_dim)).
    wqkv = jnp.zeros((L, D, QKV_PAD), jnp.float32)
    wqkv = wqkv.at[:, :, 0:D].set(p["wq"] * scale)
    wqkv = wqkv.at[:, :, D:2 * D].set(p["wk"])
    wqkv = wqkv.at[:, :, 2 * D:3 * D].set(p["wv"])
    bqkv = jnp.zeros((L, QKV_PAD), jnp.float32)
    bqkv = bqkv.at[:, 0:D].set(p["bq"] * scale)
    bqkv = bqkv.at[:, D:2 * D].set(p["bk"])
    bqkv = bqkv.at[:, 2 * D:3 * D].set(p["bv"])
    kp["wqkv"], kp["bqkv"] = wqkv, bqkv

    for name in ["wo", "bo", "ln1g", "ln1b", "w1", "b1", "w2", "b2", "ln2g", "ln2b"]:
        kp[name] = p[name]

    # Lane-dense padded output projection (built once, not per call).
    kp["wout_pad"] = jnp.zeros((D, VOCAB_PAD), jnp.float32).at[:, :VOCAB].set(p["wout"])
    kp["bout_pad"] = jnp.zeros((1, VOCAB_PAD), jnp.float32).at[:, :VOCAB].set(p["bout"])

    # Constant part of the folded-batch attention bias: causal AND block-diagonal
    # (batch elements folded into one (R, R) block never attend across each other).
    r = jnp.arange(ROWS)
    row_batch = r // SEQ
    pos_in_seq = r % SEQ
    kp["row_batch"] = row_batch
    kp["col_pos"] = pos_in_seq
    kp["const_keep"] = ((row_batch[:, None] == row_batch[None, :]) &
                        (pos_in_seq[None, :] <= pos_in_seq[:, None]))
    return kp


def transformer_lm_forward(kp, tokens, src_len):
    # input_embed + pos_embed (offset 0); embedding_dropout disabled (default -1.0).
    x = kp["embedding"][tokens] + kp["pe"][:SEQ][None, :, :]          # (B, S, D)
    x_flat = x.reshape(ROWS, STATE_SIZE).astype(jnp.float32)          # (B*S, D)

    # generate_len_mask (key padding) combined with the precomputed causal + block-diag
    # constant; only this src_len-dependent part is rebuilt per call.
    keep = kp["const_keep"] & (kp["col_pos"][None, :] < src_len[kp["row_batch"]][:, None])
    bias = jnp.where(keep, 0.0, NEG_INF).astype(jnp.float32)          # (R, R)

    logits_pad = pl.pallas_call(
        transformer_lm_kernel,
        out_shape=jax.ShapeDtypeStruct((ROWS, VOCAB_PAD), jnp.float32),
        compiler_params=pltpu.CompilerParams(vmem_limit_bytes=32 * 1024 * 1024),
    )(x_flat, bias, *[kp[k] for k in WEIGHT_ORDER])

    logits = logits_pad.reshape(BATCH, SEQ, VOCAB_PAD)[:, :, :VOCAB]
    # matches run_teacher_forcing: {'output': TransformerResult(output_map(res), src_len)}
    return {"output": {"data": logits, "length": src_len}}


def reference_forward(params, tokens, src_len):
    """Pure-JAX reference mirroring the module math (for correctness check)."""
    x = params["embedding"][tokens] + params["pe"][:SEQ][None, :, :]
    pos = jnp.arange(SEQ)
    causal = pos[None, :] <= pos[:, None]
    keep = causal[None, :, :] & (pos[None, None, :] < src_len[:, None, None])
    bias_all = jnp.where(keep, 0.0, NEG_INF).astype(jnp.float32)
    x_all = x.astype(jnp.float32)

    scale = 1.0 / math.sqrt(HEAD_DIM)
    outs = []
    for b in range(BATCH):
        x, bias = x_all[b], bias_all[b]
        for l in range(NUM_LAYERS):
            q = x @ params["wq"][l] + params["bq"][l]
            k = x @ params["wk"][l] + params["bk"][l]
            v = x @ params["wv"][l] + params["bv"][l]
            heads = []
            for h in range(NUM_HEADS):
                sl = slice(h * HEAD_DIM, (h + 1) * HEAD_DIM)
                s = q[:, sl] @ k[:, sl].T * scale + bias
                p = jax.nn.softmax(s, axis=-1)
                heads.append(p @ v[:, sl])
            attn = jnp.concatenate(heads, axis=-1) @ params["wo"][l] + params["bo"][l]
            x = _layer_norm(x + attn, params["ln1g"][l], params["ln1b"][l])
            ff = jnp.maximum(x @ params["w1"][l] + params["b1"][l], 0.0) \
                 @ params["w2"][l] + params["b2"][l]
            x = _layer_norm(x + ff, params["ln2g"][l], params["ln2b"][l])
        outs.append(x @ params["wout"] + params["bout"])
    return jnp.stack(outs, axis=0)


if __name__ == "__main__":
    key = jax.random.PRNGKey(0)
    pkey, tkey = jax.random.split(key)
    params = init_params(pkey)
    kparams = prepare_kernel_params(params)

    # src: token ids [B, S] (values < n_input_tokens), src_len: [B]
    tokens = jax.random.randint(tkey, (BATCH, SEQ), 0, N_INPUT_TOKENS, dtype=jnp.int32)
    src_len = jnp.array([SEQ, 5], dtype=jnp.int32)

    out = transformer_lm_forward(kparams, tokens, src_len)
    logits = jax.block_until_ready(out["output"]["data"])

    ref = reference_forward(params, tokens, src_len)
    assert logits.shape == (BATCH, SEQ, VOCAB)
    assert bool(jnp.all(jnp.isfinite(logits)))
    assert bool(jnp.allclose(logits, ref, atol=1e-2, rtol=1e-2)), (
        "max abs diff: %e" % float(jnp.max(jnp.abs(logits - ref))))
    print("KERNEL_OK")

# TODO(synk): the custom `Transformer` class (stack_tape / attachment_logits path) is not
# provided in the reference; a standard post-LN causal encoder with key-padding mask is
# implemented instead, and dropout layers are disabled (defaults -1.0 => identity).
</pallas_src>

<mosaic_0001>
module attributes {stable_mosaic.version = 11 : i64} {
  func.func @transformer_lm_kernel(%arg0: memref<16x32xf32, #tpu.memory_space<vmem>>, %arg1: memref<16x16xf32, #tpu.memory_space<vmem>>, %arg2: memref<2x32x128xf32, #tpu.memory_space<vmem>>, %arg3: memref<2x128xf32, #tpu.memory_space<vmem>>, %arg4: memref<2x32x32xf32, #tpu.memory_space<vmem>>, %arg5: memref<2x32xf32, #tpu.memory_space<vmem>>, %arg6: memref<2x32xf32, #tpu.memory_space<vmem>>, %arg7: memref<2x32xf32, #tpu.memory_space<vmem>>, %arg8: memref<2x32x32xf32, #tpu.memory_space<vmem>>, %arg9: memref<2x32xf32, #tpu.memory_space<vmem>>, %arg10: memref<2x32x32xf32, #tpu.memory_space<vmem>>, %arg11: memref<2x32xf32, #tpu.memory_space<vmem>>, %arg12: memref<2x32xf32, #tpu.memory_space<vmem>>, %arg13: memref<2x32xf32, #tpu.memory_space<vmem>>, %arg14: memref<32x128xf32, #tpu.memory_space<vmem>>, %arg15: memref<1x128xf32, #tpu.memory_space<vmem>>, %arg16: memref<16x128xf32, #tpu.memory_space<vmem>>) attributes {dimension_semantics = [], scalar_prefetch = 0 : i64, scratch_operands = 0 : i64, tpu.core_type = #tpu.core_type<tc>} {
    %c0 = arith.constant 0 : index
    %c0_0 = arith.constant 0 : index
    %0 = vector.load %arg0[%c0, %c0_0] : memref<16x32xf32, #tpu.memory_space<vmem>>, vector<16x32xf32>
    %c0_1 = arith.constant 0 : index
    %c0_2 = arith.constant 0 : index
    %1 = vector.load %arg1[%c0_1, %c0_2] : memref<16x16xf32, #tpu.memory_space<vmem>>, vector<16x16xf32>
    %2 = tpu.iota {dimensions = array<i32: 1>} : vector<1x32xi32>
    %c0_i32 = arith.constant 0 : i32
    %3 = vector.broadcast %c0_i32 : i32 to vector<1x32xi32>
    %4 = arith.cmpi sge, %2, %3 : vector<1x32xi32>
    %c8_i32 = arith.constant 8 : i32
    %5 = vector.broadcast %c8_i32 : i32 to vector<1x32xi32>
    %6 = arith.cmpi slt, %2, %5 : vector<1x32xi32>
    %7 = arith.andi %4, %6 : vector<1x32xi1>
    %8 = arith.extui %7 : vector<1x32xi1> to vector<1x32xi32>
    %9 = arith.sitofp %8 : vector<1x32xi32> to vector<1x32xf32>
    %c8_i32_3 = arith.constant 8 : i32
    %10 = vector.broadcast %c8_i32_3 : i32 to vector<1x32xi32>
    %11 = arith.cmpi sge, %2, %10 : vector<1x32xi32>
    %c16_i32 = arith.constant 16 : i32
    %12 = vector.broadcast %c16_i32 : i32 to vector<1x32xi32>
    %13 = arith.cmpi slt, %2, %12 : vector<1x32xi32>
    %14 = arith.andi %11, %13 : vector<1x32xi1>
    %15 = arith.extui %14 : vector<1x32xi1> to vector<1x32xi32>
    %16 = arith.sitofp %15 : vector<1x32xi32> to vector<1x32xf32>
    %c16_i32_4 = arith.constant 16 : i32
    %17 = vector.broadcast %c16_i32_4 : i32 to vector<1x32xi32>
    %18 = arith.cmpi sge, %2, %17 : vector<1x32xi32>
    %c24_i32 = arith.constant 24 : i32
    %19 = vector.broadcast %c24_i32 : i32 to vector<1x32xi32>
    %20 = arith.cmpi slt, %2, %19 : vector<1x32xi32>
    %21 = arith.andi %18, %20 : vector<1x32xi1>
    %22 = arith.extui %21 : vector<1x32xi1> to vector<1x32xi32>
    %23 = arith.sitofp %22 : vector<1x32xi32> to vector<1x32xf32>
    %c24_i32_5 = arith.constant 24 : i32
    %24 = vector.broadcast %c24_i32_5 : i32 to vector<1x32xi32>
    %25 = arith.cmpi sge, %2, %24 : vector<1x32xi32>
    %c32_i32 = arith.constant 32 : i32
    %26 = vector.broadcast %c32_i32 : i32 to vector<1x32xi32>
    %27 = arith.cmpi slt, %2, %26 : vector<1x32xi32>
    %28 = arith.andi %25, %27 : vector<1x32xi1>
    %29 = arith.extui %28 : vector<1x32xi1> to vector<1x32xi32>
    %30 = arith.sitofp %29 : vector<1x32xi32> to vector<1x32xf32>
    %c0_6 = arith.constant 0 : index
    %c0_7 = arith.constant 0 : index
    %c0_8 = arith.constant 0 : index
    %31 = vector.load %arg2[%c0_6, %c0_7, %c0_8] : memref<2x32x128xf32, #tpu.memory_space<vmem>>, vector<1x32x128xf32>
    %32 = vector.shape_cast %31 : vector<1x32x128xf32> to vector<32x128xf32>
    %cst = arith.constant dense<0.000000e+00> : vector<16x128xf32>
    %33 = tpu.matmul %0, %32, %cst {dimension_numbers = #tpu.dot_dimension_numbers<[1], [0], [0], [1], [0, 0, 1, 1], [], []>} : vector<16x32xf32>, vector<32x128xf32>, vector<16x128xf32> -> vector<16x128xf32>
    %c0_9 = arith.constant 0 : index
    %c0_10 = arith.constant 0 : index
    %34 = vector.load %arg3[%c0_9, %c0_10] : memref<2x128xf32, #tpu.memory_space<vmem>>, vector<1x128xf32>
    %35 = vector.shape_cast %34 : vector<1x128xf32> to vector<128xf32>
    %36 = vector.shape_cast %35 : vector<128xf32> to vector<1x128xf32>
    %37 = vector.broadcast %36 : vector<1x128xf32> to vector<16x128xf32>
    %38 = arith.addf %33, %37 : vector<16x128xf32>
    %39 = vector.extract_strided_slice %38 {offsets = [0, 0], sizes = [16, 32], strides = [1, 1]} : vector<16x128xf32> to vector<16x32xf32>
    %40 = vector.extract_strided_slice %38 {offsets = [0, 32], sizes = [16, 32], strides = [1, 1]} : vector<16x128xf32> to vector<16x32xf32>
    %41 = vector.extract_strided_slice %38 {offsets = [0, 64], sizes = [16, 32], strides = [1, 1]} : vector<16x128xf32> to vector<16x32xf32>
    %cst_11 = arith.constant 0.000000e+00 : f32
    %42 = vector.broadcast %cst_11 : f32 to vector<16x32xf32>
    %43 = vector.broadcast %9 : vector<1x32xf32> to vector<16x32xf32>
    %44 = arith.mulf %39, %43 : vector<16x32xf32>
    %cst_12 = arith.constant dense<0.000000e+00> : vector<16x16xf32>
    %45 = tpu.matmul %44, %40, %cst_12 {dimension_numbers = #tpu.dot_dimension_numbers<[1], [1], [0], [0], [0, 0, 1, 0], [], []>} : vector<16x32xf32>, vector<16x32xf32>, vector<16x16xf32> -> vector<16x16xf32>
    %46 = arith.addf %45, %1 : vector<16x16xf32>
    %cst_13 = arith.constant dense<0xFF800000> : vector<16xf32>
    %47 = vector.multi_reduction <maximumf>, %46, %cst_13 [1] : vector<16x16xf32> to vector<16xf32>
    %48 = vector.shape_cast %47 : vector<16xf32> to vector<16x1xf32>
    %49 = vector.broadcast %48 : vector<16x1xf32> to vector<16x16xf32>
    %50 = arith.subf %46, %49 : vector<16x16xf32>
    %51 = math.exp %50 : vector<16x16xf32>
    %cst_14 = arith.constant dense<0.000000e+00> : vector<16xf32>
    %52 = vector.multi_reduction <add>, %51, %cst_14 [1] : vector<16x16xf32> to vector<16xf32>
    %53 = vector.shape_cast %52 : vector<16xf32> to vector<16x1xf32>
    %54 = tpu.reciprocal %53 {approx = true} : vector<16x1xf32> -> vector<16x1xf32>
    %55 = vector.broadcast %54 : vector<16x1xf32> to vector<16x16xf32>
    %56 = arith.mulf %51, %55 : vector<16x16xf32>
    %57 = vector.broadcast %9 : vector<1x32xf32> to vector<16x32xf32>
    %58 = arith.mulf %41, %57 : vector<16x32xf32>
    %cst_15 = arith.constant dense<0.000000e+00> : vector<16x32xf32>
    %59 = tpu.matmul %56, %58, %cst_15 {dimension_numbers = #tpu.dot_dimension_numbers<[1], [0], [0], [1], [0, 0, 1, 1], [], []>} : vector<16x16xf32>, vector<16x32xf32>, vector<16x32xf32> -> vector<16x32xf32>
    %60 = arith.addf %42, %59 : vector<16x32xf32>
    %61 = vector.broadcast %16 : vector<1x32xf32> to vector<16x32xf32>
    %62 = arith.mulf %39, %61 : vector<16x32xf32>
    %cst_16 = arith.constant dense<0.000000e+00> : vector<16x16xf32>
    %63 = tpu.matmul %62, %40, %cst_16 {dimension_numbers = #tpu.dot_dimension_numbers<[1], [1], [0], [0], [0, 0, 1, 0], [], []>} : vector<16x32xf32>, vector<16x32xf32>, vector<16x16xf32> -> vector<16x16xf32>
    %64 = arith.addf %63, %1 : vector<16x16xf32>
    %cst_17 = arith.constant dense<0xFF800000> : vector<16xf32>
    %65 = vector.multi_reduction <maximumf>, %64, %cst_17 [1] : vector<16x16xf32> to vector<16xf32>
    %66 = vector.shape_cast %65 : vector<16xf32> to vector<16x1xf32>
    %67 = vector.broadcast %66 : vector<16x1xf32> to vector<16x16xf32>
    %68 = arith.subf %64, %67 : vector<16x16xf32>
    %69 = math.exp %68 : vector<16x16xf32>
    %cst_18 = arith.constant dense<0.000000e+00> : vector<16xf32>
    %70 = vector.multi_reduction <add>, %69, %cst_18 [1] : vector<16x16xf32> to vector<16xf32>
    %71 = vector.shape_cast %70 : vector<16xf32> to vector<16x1xf32>
    %72 = tpu.reciprocal %71 {approx = true} : vector<16x1xf32> -> vector<16x1xf32>
    %73 = vector.broadcast %72 : vector<16x1xf32> to vector<16x16xf32>
    %74 = arith.mulf %69, %73 : vector<16x16xf32>
    %75 = vector.broadcast %16 : vector<1x32xf32> to vector<16x32xf32>
    %76 = arith.mulf %41, %75 : vector<16x32xf32>
    %cst_19 = arith.constant dense<0.000000e+00> : vector<16x32xf32>
    %77 = tpu.matmul %74, %76, %cst_19 {dimension_numbers = #tpu.dot_dimension_numbers<[1], [0], [0], [1], [0, 0, 1, 1], [], []>} : vector<16x16xf32>, vector<16x32xf32>, vector<16x32xf32> -> vector<16x32xf32>
    %78 = arith.addf %60, %77 : vector<16x32xf32>
    %79 = vector.broadcast %23 : vector<1x32xf32> to vector<16x32xf32>
    %80 = arith.mulf %39, %79 : vector<16x32xf32>
    %cst_20 = arith.constant dense<0.000000e+00> : vector<16x16xf32>
    %81 = tpu.matmul %80, %40, %cst_20 {dimension_numbers = #tpu.dot_dimension_numbers<[1], [1], [0], [0], [0, 0, 1, 0], [], []>} : vector<16x32xf32>, vector<16x32xf32>, vector<16x16xf32> -> vector<16x16xf32>
    %82 = arith.addf %81, %1 : vector<16x16xf32>
    %cst_21 = arith.constant dense<0xFF800000> : vector<16xf32>
    %83 = vector.multi_reduction <maximumf>, %82, %cst_21 [1] : vector<16x16xf32> to vector<16xf32>
    %84 = vector.shape_cast %83 : vector<16xf32> to vector<16x1xf32>
    %85 = vector.broadcast %84 : vector<16x1xf32> to vector<16x16xf32>
    %86 = arith.subf %82, %85 : vector<16x16xf32>
    %87 = math.exp %86 : vector<16x16xf32>
    %cst_22 = arith.constant dense<0.000000e+00> : vector<16xf32>
    %88 = vector.multi_reduction <add>, %87, %cst_22 [1] : vector<16x16xf32> to vector<16xf32>
    %89 = vector.shape_cast %88 : vector<16xf32> to vector<16x1xf32>
    %90 = tpu.reciprocal %89 {approx = true} : vector<16x1xf32> -> vector<16x1xf32>
    %91 = vector.broadcast %90 : vector<16x1xf32> to vector<16x16xf32>
    %92 = arith.mulf %87, %91 : vector<16x16xf32>
    %93 = vector.broadcast %23 : vector<1x32xf32> to vector<16x32xf32>
    %94 = arith.mulf %41, %93 : vector<16x32xf32>
    %cst_23 = arith.constant dense<0.000000e+00> : vector<16x32xf32>
    %95 = tpu.matmul %92, %94, %cst_23 {dimension_numbers = #tpu.dot_dimension_numbers<[1], [0], [0], [1], [0, 0, 1, 1], [], []>} : vector<16x16xf32>, vector<16x32xf32>, vector<16x32xf32> -> vector<16x32xf32>
    %96 = arith.addf %78, %95 : vector<16x32xf32>
    %97 = vector.broadcast %30 : vector<1x32xf32> to vector<16x32xf32>
    %98 = arith.mulf %39, %97 : vector<16x32xf32>
    %cst_24 = arith.constant dense<0.000000e+00> : vector<16x16xf32>
    %99 = tpu.matmul %98, %40, %cst_24 {dimension_numbers = #tpu.dot_dimension_numbers<[1], [1], [0], [0], [0, 0, 1, 0], [], []>} : vector<16x32xf32>, vector<16x32xf32>, vector<16x16xf32> -> vector<16x16xf32>
    %100 = arith.addf %99, %1 : vector<16x16xf32>
    %cst_25 = arith.constant dense<0xFF800000> : vector<16xf32>
    %101 = vector.multi_reduction <maximumf>, %100, %cst_25 [1] : vector<16x16xf32> to vector<16xf32>
    %102 = vector.shape_cast %101 : vector<16xf32> to vector<16x1xf32>
    %103 = vector.broadcast %102 : vector<16x1xf32> to vector<16x16xf32>
    %104 = arith.subf %100, %103 : vector<16x16xf32>
    %105 = math.exp %104 : vector<16x16xf32>
    %cst_26 = arith.constant dense<0.000000e+00> : vector<16xf32>
    %106 = vector.multi_reduction <add>, %105, %cst_26 [1] : vector<16x16xf32> to vector<16xf32>
    %107 = vector.shape_cast %106 : vector<16xf32> to vector<16x1xf32>
    %108 = tpu.reciprocal %107 {approx = true} : vector<16x1xf32> -> vector<16x1xf32>
    %109 = vector.broadcast %108 : vector<16x1xf32> to vector<16x16xf32>
    %110 = arith.mulf %105, %109 : vector<16x16xf32>
    %111 = vector.broadcast %30 : vector<1x32xf32> to vector<16x32xf32>
    %112 = arith.mulf %41, %111 : vector<16x32xf32>
    %cst_27 = arith.constant dense<0.000000e+00> : vector<16x32xf32>
    %113 = tpu.matmul %110, %112, %cst_27 {dimension_numbers = #tpu.dot_dimension_numbers<[1], [0], [0], [1], [0, 0, 1, 1], [], []>} : vector<16x16xf32>, vector<16x32xf32>, vector<16x32xf32> -> vector<16x32xf32>
    %114 = arith.addf %96, %113 : vector<16x32xf32>
    %c0_28 = arith.constant 0 : index
    %c0_29 = arith.constant 0 : index
    %c0_30 = arith.constant 0 : index
    %115 = vector.load %arg4[%c0_28, %c0_29, %c0_30] : memref<2x32x32xf32, #tpu.memory_space<vmem>>, vector<1x32x32xf32>
    %116 = vector.shape_cast %115 : vector<1x32x32xf32> to vector<32x32xf32>
    %cst_31 = arith.constant dense<0.000000e+00> : vector<16x32xf32>
    %117 = tpu.matmul %114, %116, %cst_31 {dimension_numbers = #tpu.dot_dimension_numbers<[1], [0], [0], [1], [0, 0, 1, 1], [], []>} : vector<16x32xf32>, vector<32x32xf32>, vector<16x32xf32> -> vector<16x32xf32>
    %c0_32 = arith.constant 0 : index
    %c0_33 = arith.constant 0 : index
    %118 = vector.load %arg5[%c0_32, %c0_33] : memref<2x32xf32, #tpu.memory_space<vmem>>, vector<1x32xf32>
    %119 = vector.shape_cast %118 : vector<1x32xf32> to vector<32xf32>
    %120 = vector.shape_cast %119 : vector<32xf32> to vector<1x32xf32>
    %121 = vector.broadcast %120 : vector<1x32xf32> to vector<16x32xf32>
    %122 = arith.addf %117, %121 : vector<16x32xf32>
    %123 = arith.addf %0, %122 : vector<16x32xf32>
    %c0_34 = arith.constant 0 : index
    %c0_35 = arith.constant 0 : index
    %124 = vector.load %arg6[%c0_34, %c0_35] : memref<2x32xf32, #tpu.memory_space<vmem>>, vector<1x32xf32>
    %125 = vector.shape_cast %124 : vector<1x32xf32> to vector<32xf32>
    %c0_36 = arith.constant 0 : index
    %c0_37 = arith.constant 0 : index
    %126 = vector.load %arg7[%c0_36, %c0_37] : memref<2x32xf32, #tpu.memory_space<vmem>>, vector<1x32xf32>
    %127 = vector.shape_cast %126 : vector<1x32xf32> to vector<32xf32>
    %cst_38 = arith.constant dense<0.000000e+00> : vector<16xf32>
    %128 = vector.multi_reduction <add>, %123, %cst_38 [1] : vector<16x32xf32> to vector<16xf32>
    %129 = vector.shape_cast %128 : vector<16xf32> to vector<16x1xf32>
    %cst_39 = arith.constant 3.200000e+01 : f32
    %130 = vector.broadcast %cst_39 : f32 to vector<16x1xf32>
    %131 = arith.divf %129, %130 : vector<16x1xf32>
    %132 = arith.mulf %123, %123 : vector<16x32xf32>
    %cst_40 = arith.constant dense<0.000000e+00> : vector<16xf32>
    %133 = vector.multi_reduction <add>, %132, %cst_40 [1] : vector<16x32xf32> to vector<16xf32>
    %134 = vector.shape_cast %133 : vector<16xf32> to vector<16x1xf32>
    %cst_41 = arith.constant 3.200000e+01 : f32
    %135 = vector.broadcast %cst_41 : f32 to vector<16x1xf32>
    %136 = arith.divf %134, %135 : vector<16x1xf32>
    %137 = arith.mulf %131, %131 : vector<16x1xf32>
    %138 = arith.subf %136, %137 : vector<16x1xf32>
    %139 = vector.broadcast %131 : vector<16x1xf32> to vector<16x32xf32>
    %140 = arith.subf %123, %139 : vector<16x32xf32>
    %cst_42 = arith.constant 9.99999974E-6 : f32
    %141 = vector.broadcast %cst_42 : f32 to vector<16x1xf32>
    %142 = arith.addf %138, %141 : vector<16x1xf32>
    %143 = math.rsqrt %142 : vector<16x1xf32>
    %144 = vector.broadcast %143 : vector<16x1xf32> to vector<16x32xf32>
    %145 = arith.mulf %140, %144 : vector<16x32xf32>
    %146 = vector.shape_cast %125 : vector<32xf32> to vector<1x32xf32>
    %147 = vector.broadcast %146 : vector<1x32xf32> to vector<16x32xf32>
    %148 = arith.mulf %145, %147 : vector<16x32xf32>
    %149 = vector.shape_cast %127 : vector<32xf32> to vector<1x32xf32>
    %150 = vector.broadcast %149 : vector<1x32xf32> to vector<16x32xf32>
    %151 = arith.addf %148, %150 : vector<16x32xf32>
    %c0_43 = arith.constant 0 : index
    %c0_44 = arith.constant 0 : index
    %c0_45 = arith.constant 0 : index
    %152 = vector.load %arg8[%c0_43, %c0_44, %c0_45] : memref<2x32x32xf32, #tpu.memory_space<vmem>>, vector<1x32x32xf32>
    %153 = vector.shape_cast %152 : vector<1x32x32xf32> to vector<32x32xf32>
    %cst_46 = arith.constant dense<0.000000e+00> : vector<16x32xf32>
    %154 = tpu.matmul %151, %153, %cst_46 {dimension_numbers = #tpu.dot_dimension_numbers<[1], [0], [0], [1], [0, 0, 1, 1], [], []>} : vector<16x32xf32>, vector<32x32xf32>, vector<16x32xf32> -> vector<16x32xf32>
    %c0_47 = arith.constant 0 : index
    %c0_48 = arith.constant 0 : index
    %155 = vector.load %arg9[%c0_47, %c0_48] : memref<2x32xf32, #tpu.memory_space<vmem>>, vector<1x32xf32>
    %156 = vector.shape_cast %155 : vector<1x32xf32> to vector<32xf32>
    %157 = vector.shape_cast %156 : vector<32xf32> to vector<1x32xf32>
    %158 = vector.broadcast %157 : vector<1x32xf32> to vector<16x32xf32>
    %159 = arith.addf %154, %158 : vector<16x32xf32>
    %cst_49 = arith.constant 0.000000e+00 : f32
    %160 = vector.broadcast %cst_49 : f32 to vector<16x32xf32>
    %161 = arith.maximumf %159, %160 : vector<16x32xf32>
    %c0_50 = arith.constant 0 : index
    %c0_51 = arith.constant 0 : index
    %c0_52 = arith.constant 0 : index
    %162 = vector.load %arg10[%c0_50, %c0_51, %c0_52] : memref<2x32x32xf32, #tpu.memory_space<vmem>>, vector<1x32x32xf32>
    %163 = vector.shape_cast %162 : vector<1x32x32xf32> to vector<32x32xf32>
    %cst_53 = arith.constant dense<0.000000e+00> : vector<16x32xf32>
    %164 = tpu.matmul %161, %163, %cst_53 {dimension_numbers = #tpu.dot_dimension_numbers<[1], [0], [0], [1], [0, 0, 1, 1], [], []>} : vector<16x32xf32>, vector<32x32xf32>, vector<16x32xf32> -> vector<16x32xf32>
    %c0_54 = arith.constant 0 : index
    %c0_55 = arith.constant 0 : index
    %165 = vector.load %arg11[%c0_54, %c0_55] : memref<2x32xf32, #tpu.memory_space<vmem>>, vector<1x32xf32>
    %166 = vector.shape_cast %165 : vector<1x32xf32> to vector<32xf32>
    %167 = vector.shape_cast %166 : vector<32xf32> to vector<1x32xf32>
    %168 = vector.broadcast %167 : vector<1x32xf32> to vector<16x32xf32>
    %169 = arith.addf %164, %168 : vector<16x32xf32>
    %170 = arith.addf %151, %169 : vector<16x32xf32>
    %c0_56 = arith.constant 0 : index
    %c0_57 = arith.constant 0 : index
    %171 = vector.load %arg12[%c0_56, %c0_57] : memref<2x32xf32, #tpu.memory_space<vmem>>, vector<1x32xf32>
    %172 = vector.shape_cast %171 : vector<1x32xf32> to vector<32xf32>
    %c0_58 = arith.constant 0 : index
    %c0_59 = arith.constant 0 : index
    %173 = vector.load %arg13[%c0_58, %c0_59] : memref<2x32xf32, #tpu.memory_space<vmem>>, vector<1x32xf32>
    %174 = vector.shape_cast %173 : vector<1x32xf32> to vector<32xf32>
    %cst_60 = arith.constant dense<0.000000e+00> : vector<16xf32>
    %175 = vector.multi_reduction <add>, %170, %cst_60 [1] : vector<16x32xf32> to vector<16xf32>
    %176 = vector.shape_cast %175 : vector<16xf32> to vector<16x1xf32>
    %cst_61 = arith.constant 3.200000e+01 : f32
    %177 = vector.broadcast %cst_61 : f32 to vector<16x1xf32>
    %178 = arith.divf %176, %177 : vector<16x1xf32>
    %179 = arith.mulf %170, %170 : vector<16x32xf32>
    %cst_62 = arith.constant dense<0.000000e+00> : vector<16xf32>
    %180 = vector.multi_reduction <add>, %179, %cst_62 [1] : vector<16x32xf32> to vector<16xf32>
    %181 = vector.shape_cast %180 : vector<16xf32> to vector<16x1xf32>
    %cst_63 = arith.constant 3.200000e+01 : f32
    %182 = vector.broadcast %cst_63 : f32 to vector<16x1xf32>
    %183 = arith.divf %181, %182 : vector<16x1xf32>
    %184 = arith.mulf %178, %178 : vector<16x1xf32>
    %185 = arith.subf %183, %184 : vector<16x1xf32>
    %186 = vector.broadcast %178 : vector<16x1xf32> to vector<16x32xf32>
    %187 = arith.subf %170, %186 : vector<16x32xf32>
    %cst_64 = arith.constant 9.99999974E-6 : f32
    %188 = vector.broadcast %cst_64 : f32 to vector<16x1xf32>
    %189 = arith.addf %185, %188 : vector<16x1xf32>
    %190 = math.rsqrt %189 : vector<16x1xf32>
    %191 = vector.broadcast %190 : vector<16x1xf32> to vector<16x32xf32>
    %192 = arith.mulf %187, %191 : vector<16x32xf32>
    %193 = vector.shape_cast %172 : vector<32xf32> to vector<1x32xf32>
    %194 = vector.broadcast %193 : vector<1x32xf32> to vector<16x32xf32>
    %195 = arith.mulf %192, %194 : vector<16x32xf32>
    %196 = vector.shape_cast %174 : vector<32xf32> to vector<1x32xf32>
    %197 = vector.broadcast %196 : vector<1x32xf32> to vector<16x32xf32>
    %198 = arith.addf %195, %197 : vector<16x32xf32>
    %c1 = arith.constant 1 : index
    %c0_65 = arith.constant 0 : index
    %c0_66 = arith.constant 0 : index
    %199 = vector.load %arg2[%c1, %c0_65, %c0_66] : memref<2x32x128xf32, #tpu.memory_space<vmem>>, vector<1x32x128xf32>
    %200 = vector.shape_cast %199 : vector<1x32x128xf32> to vector<32x128xf32>
    %cst_67 = arith.constant dense<0.000000e+00> : vector<16x128xf32>
    %201 = tpu.matmul %198, %200, %cst_67 {dimension_numbers = #tpu.dot_dimension_numbers<[1], [0], [0], [1], [0, 0, 1, 1], [], []>} : vector<16x32xf32>, vector<32x128xf32>, vector<16x128xf32> -> vector<16x128xf32>
    %c1_68 = arith.constant 1 : index
    %c0_69 = arith.constant 0 : index
    %202 = vector.load %arg3[%c1_68, %c0_69] : memref<2x128xf32, #tpu.memory_space<vmem>>, vector<1x128xf32>
    %203 = vector.shape_cast %202 : vector<1x128xf32> to vector<128xf32>
    %204 = vector.shape_cast %203 : vector<128xf32> to vector<1x128xf32>
    %205 = vector.broadcast %204 : vector<1x128xf32> to vector<16x128xf32>
    %206 = arith.addf %201, %205 : vector<16x128xf32>
    %207 = vector.extract_strided_slice %206 {offsets = [0, 0], sizes = [16, 32], strides = [1, 1]} : vector<16x128xf32> to vector<16x32xf32>
    %208 = vector.extract_strided_slice %206 {offsets = [0, 32], sizes = [16, 32], strides = [1, 1]} : vector<16x128xf32> to vector<16x32xf32>
    %209 = vector.extract_strided_slice %206 {offsets = [0, 64], sizes = [16, 32], strides = [1, 1]} : vector<16x128xf32> to vector<16x32xf32>
    %cst_70 = arith.constant 0.000000e+00 : f32
    %210 = vector.broadcast %cst_70 : f32 to vector<16x32xf32>
    %211 = vector.broadcast %9 : vector<1x32xf32> to vector<16x32xf32>
    %212 = arith.mulf %207, %211 : vector<16x32xf32>
    %cst_71 = arith.constant dense<0.000000e+00> : vector<16x16xf32>
    %213 = tpu.matmul %212, %208, %cst_71 {dimension_numbers = #tpu.dot_dimension_numbers<[1], [1], [0], [0], [0, 0, 1, 0], [], []>} : vector<16x32xf32>, vector<16x32xf32>, vector<16x16xf32> -> vector<16x16xf32>
    %214 = arith.addf %213, %1 : vector<16x16xf32>
    %cst_72 = arith.constant dense<0xFF800000> : vector<16xf32>
    %215 = vector.multi_reduction <maximumf>, %214, %cst_72 [1] : vector<16x16xf32> to vector<16xf32>
    %216 = vector.shape_cast %215 : vector<16xf32> to vector<16x1xf32>
    %217 = vector.broadcast %216 : vector<16x1xf32> to vector<16x16xf32>
    %218 = arith.subf %214, %217 : vector<16x16xf32>
    %219 = math.exp %218 : vector<16x16xf32>
    %cst_73 = arith.constant dense<0.000000e+00> : vector<16xf32>
    %220 = vector.multi_reduction <add>, %219, %cst_73 [1] : vector<16x16xf32> to vector<16xf32>
    %221 = vector.shape_cast %220 : vector<16xf32> to vector<16x1xf32>
    %222 = tpu.reciprocal %221 {approx = true} : vector<16x1xf32> -> vector<16x1xf32>
    %223 = vector.broadcast %222 : vector<16x1xf32> to vector<16x16xf32>
    %224 = arith.mulf %219, %223 : vector<16x16xf32>
    %225 = vector.broadcast %9 : vector<1x32xf32> to vector<16x32xf32>
    %226 = arith.mulf %209, %225 : vector<16x32xf32>
    %cst_74 = arith.constant dense<0.000000e+00> : vector<16x32xf32>
    %227 = tpu.matmul %224, %226, %cst_74 {dimension_numbers = #tpu.dot_dimension_numbers<[1], [0], [0], [1], [0, 0, 1, 1], [], []>} : vector<16x16xf32>, vector<16x32xf32>, vector<16x32xf32> -> vector<16x32xf32>
    %228 = arith.addf %210, %227 : vector<16x32xf32>
    %229 = vector.broadcast %16 : vector<1x32xf32> to vector<16x32xf32>
    %230 = arith.mulf %207, %229 : vector<16x32xf32>
    %cst_75 = arith.constant dense<0.000000e+00> : vector<16x16xf32>
    %231 = tpu.matmul %230, %208, %cst_75 {dimension_numbers = #tpu.dot_dimension_numbers<[1], [1], [0], [0], [0, 0, 1, 0], [], []>} : vector<16x32xf32>, vector<16x32xf32>, vector<16x16xf32> -> vector<16x16xf32>
    %232 = arith.addf %231, %1 : vector<16x16xf32>
    %cst_76 = arith.constant dense<0xFF800000> : vector<16xf32>
    %233 = vector.multi_reduction <maximumf>, %232, %cst_76 [1] : vector<16x16xf32> to vector<16xf32>
    %234 = vector.shape_cast %233 : vector<16xf32> to vector<16x1xf32>
    %235 = vector.broadcast %234 : vector<16x1xf32> to vector<16x16xf32>
    %236 = arith.subf %232, %235 : vector<16x16xf32>
    %237 = math.exp %236 : vector<16x16xf32>
    %cst_77 = arith.constant dense<0.000000e+00> : vector<16xf32>
    %238 = vector.multi_reduction <add>, %237, %cst_77 [1] : vector<16x16xf32> to vector<16xf32>
    %239 = vector.shape_cast %238 : vector<16xf32> to vector<16x1xf32>
    %240 = tpu.reciprocal %239 {approx = true} : vector<16x1xf32> -> vector<16x1xf32>
    %241 = vector.broadcast %240 : vector<16x1xf32> to vector<16x16xf32>
    %242 = arith.mulf %237, %241 : vector<16x16xf32>
    %243 = vector.broadcast %16 : vector<1x32xf32> to vector<16x32xf32>
    %244 = arith.mulf %209, %243 : vector<16x32xf32>
    %cst_78 = arith.constant dense<0.000000e+00> : vector<16x32xf32>
    %245 = tpu.matmul %242, %244, %cst_78 {dimension_numbers = #tpu.dot_dimension_numbers<[1], [0], [0], [1], [0, 0, 1, 1], [], []>} : vector<16x16xf32>, vector<16x32xf32>, vector<16x32xf32> -> vector<16x32xf32>
    %246 = arith.addf %228, %245 : vector<16x32xf32>
    %247 = vector.broadcast %23 : vector<1x32xf32> to vector<16x32xf32>
    %248 = arith.mulf %207, %247 : vector<16x32xf32>
    %cst_79 = arith.constant dense<0.000000e+00> : vector<16x16xf32>
    %249 = tpu.matmul %248, %208, %cst_79 {dimension_numbers = #tpu.dot_dimension_numbers<[1], [1], [0], [0], [0, 0, 1, 0], [], []>} : vector<16x32xf32>, vector<16x32xf32>, vector<16x16xf32> -> vector<16x16xf32>
    %250 = arith.addf %249, %1 : vector<16x16xf32>
    %cst_80 = arith.constant dense<0xFF800000> : vector<16xf32>
    %251 = vector.multi_reduction <maximumf>, %250, %cst_80 [1] : vector<16x16xf32> to vector<16xf32>
    %252 = vector.shape_cast %251 : vector<16xf32> to vector<16x1xf32>
    %253 = vector.broadcast %252 : vector<16x1xf32> to vector<16x16xf32>
    %254 = arith.subf %250, %253 : vector<16x16xf32>
    %255 = math.exp %254 : vector<16x16xf32>
    %cst_81 = arith.constant dense<0.000000e+00> : vector<16xf32>
    %256 = vector.multi_reduction <add>, %255, %cst_81 [1] : vector<16x16xf32> to vector<16xf32>
    %257 = vector.shape_cast %256 : vector<16xf32> to vector<16x1xf32>
    %258 = tpu.reciprocal %257 {approx = true} : vector<16x1xf32> -> vector<16x1xf32>
    %259 = vector.broadcast %258 : vector<16x1xf32> to vector<16x16xf32>
    %260 = arith.mulf %255, %259 : vector<16x16xf32>
    %261 = vector.broadcast %23 : vector<1x32xf32> to vector<16x32xf32>
    %262 = arith.mulf %209, %261 : vector<16x32xf32>
    %cst_82 = arith.constant dense<0.000000e+00> : vector<16x32xf32>
    %263 = tpu.matmul %260, %262, %cst_82 {dimension_numbers = #tpu.dot_dimension_numbers<[1], [0], [0], [1], [0, 0, 1, 1], [], []>} : vector<16x16xf32>, vector<16x32xf32>, vector<16x32xf32> -> vector<16x32xf32>
    %264 = arith.addf %246, %263 : vector<16x32xf32>
    %265 = vector.broadcast %30 : vector<1x32xf32> to vector<16x32xf32>
    %266 = arith.mulf %207, %265 : vector<16x32xf32>
    %cst_83 = arith.constant dense<0.000000e+00> : vector<16x16xf32>
    %267 = tpu.matmul %266, %208, %cst_83 {dimension_numbers = #tpu.dot_dimension_numbers<[1], [1], [0], [0], [0, 0, 1, 0], [], []>} : vector<16x32xf32>, vector<16x32xf32>, vector<16x16xf32> -> vector<16x16xf32>
    %268 = arith.addf %267, %1 : vector<16x16xf32>
    %cst_84 = arith.constant dense<0xFF800000> : vector<16xf32>
    %269 = vector.multi_reduction <maximumf>, %268, %cst_84 [1] : vector<16x16xf32> to vector<16xf32>
    %270 = vector.shape_cast %269 : vector<16xf32> to vector<16x1xf32>
    %271 = vector.broadcast %270 : vector<16x1xf32> to vector<16x16xf32>
    %272 = arith.subf %268, %271 : vector<16x16xf32>
    %273 = math.exp %272 : vector<16x16xf32>
    %cst_85 = arith.constant dense<0.000000e+00> : vector<16xf32>
    %274 = vector.multi_reduction <add>, %273, %cst_85 [1] : vector<16x16xf32> to vector<16xf32>
    %275 = vector.shape_cast %274 : vector<16xf32> to vector<16x1xf32>
    %276 = tpu.reciprocal %275 {approx = true} : vector<16x1xf32> -> vector<16x1xf32>
    %277 = vector.broadcast %276 : vector<16x1xf32> to vector<16x16xf32>
    %278 = arith.mulf %273, %277 : vector<16x16xf32>
    %279 = vector.broadcast %30 : vector<1x32xf32> to vector<16x32xf32>
    %280 = arith.mulf %209, %279 : vector<16x32xf32>
    %cst_86 = arith.constant dense<0.000000e+00> : vector<16x32xf32>
    %281 = tpu.matmul %278, %280, %cst_86 {dimension_numbers = #tpu.dot_dimension_numbers<[1], [0], [0], [1], [0, 0, 1, 1], [], []>} : vector<16x16xf32>, vector<16x32xf32>, vector<16x32xf32> -> vector<16x32xf32>
    %282 = arith.addf %264, %281 : vector<16x32xf32>
    %c1_87 = arith.constant 1 : index
    %c0_88 = arith.constant 0 : index
    %c0_89 = arith.constant 0 : index
    %283 = vector.load %arg4[%c1_87, %c0_88, %c0_89] : memref<2x32x32xf32, #tpu.memory_space<vmem>>, vector<1x32x32xf32>
    %284 = vector.shape_cast %283 : vector<1x32x32xf32> to vector<32x32xf32>
    %cst_90 = arith.constant dense<0.000000e+00> : vector<16x32xf32>
    %285 = tpu.matmul %282, %284, %cst_90 {dimension_numbers = #tpu.dot_dimension_numbers<[1], [0], [0], [1], [0, 0, 1, 1], [], []>} : vector<16x32xf32>, vector<32x32xf32>, vector<16x32xf32> -> vector<16x32xf32>
    %c1_91 = arith.constant 1 : index
    %c0_92 = arith.constant 0 : index
    %286 = vector.load %arg5[%c1_91, %c0_92] : memref<2x32xf32, #tpu.memory_space<vmem>>, vector<1x32xf32>
    %287 = vector.shape_cast %286 : vector<1x32xf32> to vector<32xf32>
    %288 = vector.shape_cast %287 : vector<32xf32> to vector<1x32xf32>
    %289 = vector.broadcast %288 : vector<1x32xf32> to vector<16x32xf32>
    %290 = arith.addf %285, %289 : vector<16x32xf32>
    %291 = arith.addf %198, %290 : vector<16x32xf32>
    %c1_93 = arith.constant 1 : index
    %c0_94 = arith.constant 0 : index
    %292 = vector.load %arg6[%c1_93, %c0_94] : memref<2x32xf32, #tpu.memory_space<vmem>>, vector<1x32xf32>
    %293 = vector.shape_cast %292 : vector<1x32xf32> to vector<32xf32>
    %c1_95 = arith.constant 1 : index
    %c0_96 = arith.constant 0 : index
    %294 = vector.load %arg7[%c1_95, %c0_96] : memref<2x32xf32, #tpu.memory_space<vmem>>, vector<1x32xf32>
    %295 = vector.shape_cast %294 : vector<1x32xf32> to vector<32xf32>
    %cst_97 = arith.constant dense<0.000000e+00> : vector<16xf32>
    %296 = vector.multi_reduction <add>, %291, %cst_97 [1] : vector<16x32xf32> to vector<16xf32>
    %297 = vector.shape_cast %296 : vector<16xf32> to vector<16x1xf32>
    %cst_98 = arith.constant 3.200000e+01 : f32
    %298 = vector.broadcast %cst_98 : f32 to vector<16x1xf32>
    %299 = arith.divf %297, %298 : vector<16x1xf32>
    %300 = arith.mulf %291, %291 : vector<16x32xf32>
    %cst_99 = arith.constant dense<0.000000e+00> : vector<16xf32>
    %301 = vector.multi_reduction <add>, %300, %cst_99 [1] : vector<16x32xf32> to vector<16xf32>
    %302 = vector.shape_cast %301 : vector<16xf32> to vector<16x1xf32>
    %cst_100 = arith.constant 3.200000e+01 : f32
    %303 = vector.broadcast %cst_100 : f32 to vector<16x1xf32>
    %304 = arith.divf %302, %303 : vector<16x1xf32>
    %305 = arith.mulf %299, %299 : vector<16x1xf32>
    %306 = arith.subf %304, %305 : vector<16x1xf32>
    %307 = vector.broadcast %299 : vector<16x1xf32> to vector<16x32xf32>
    %308 = arith.subf %291, %307 : vector<16x32xf32>
    %cst_101 = arith.constant 9.99999974E-6 : f32
    %309 = vector.broadcast %cst_101 : f32 to vector<16x1xf32>
    %310 = arith.addf %306, %309 : vector<16x1xf32>
    %311 = math.rsqrt %310 : vector<16x1xf32>
    %312 = vector.broadcast %311 : vector<16x1xf32> to vector<16x32xf32>
    %313 = arith.mulf %308, %312 : vector<16x32xf32>
    %314 = vector.shape_cast %293 : vector<32xf32> to vector<1x32xf32>
    %315 = vector.broadcast %314 : vector<1x32xf32> to vector<16x32xf32>
    %316 = arith.mulf %313, %315 : vector<16x32xf32>
    %317 = vector.shape_cast %295 : vector<32xf32> to vector<1x32xf32>
    %318 = vector.broadcast %317 : vector<1x32xf32> to vector<16x32xf32>
    %319 = arith.addf %316, %318 : vector<16x32xf32>
    %c1_102 = arith.constant 1 : index
    %c0_103 = arith.constant 0 : index
    %c0_104 = arith.constant 0 : index
    %320 = vector.load %arg8[%c1_102, %c0_103, %c0_104] : memref<2x32x32xf32, #tpu.memory_space<vmem>>, vector<1x32x32xf32>
    %321 = vector.shape_cast %320 : vector<1x32x32xf32> to vector<32x32xf32>
    %cst_105 = arith.constant dense<0.000000e+00> : vector<16x32xf32>
    %322 = tpu.matmul %319, %321, %cst_105 {dimension_numbers = #tpu.dot_dimension_numbers<[1], [0], [0], [1], [0, 0, 1, 1], [], []>} : vector<16x32xf32>, vector<32x32xf32>, vector<16x32xf32> -> vector<16x32xf32>
    %c1_106 = arith.constant 1 : index
    %c0_107 = arith.constant 0 : index
    %323 = vector.load %arg9[%c1_106, %c0_107] : memref<2x32xf32, #tpu.memory_space<vmem>>, vector<1x32xf32>
    %324 = vector.shape_cast %323 : vector<1x32xf32> to vector<32xf32>
    %325 = vector.shape_cast %324 : vector<32xf32> to vector<1x32xf32>
    %326 = vector.broadcast %325 : vector<1x32xf32> to vector<16x32xf32>
    %327 = arith.addf %322, %326 : vector<16x32xf32>
    %cst_108 = arith.constant 0.000000e+00 : f32
    %328 = vector.broadcast %cst_108 : f32 to vector<16x32xf32>
    %329 = arith.maximumf %327, %328 : vector<16x32xf32>
    %c1_109 = arith.constant 1 : index
    %c0_110 = arith.constant 0 : index
    %c0_111 = arith.constant 0 : index
    %330 = vector.load %arg10[%c1_109, %c0_110, %c0_111] : memref<2x32x32xf32, #tpu.memory_space<vmem>>, vector<1x32x32xf32>
    %331 = vector.shape_cast %330 : vector<1x32x32xf32> to vector<32x32xf32>
    %cst_112 = arith.constant dense<0.000000e+00> : vector<16x32xf32>
    %332 = tpu.matmul %329, %331, %cst_112 {dimension_numbers = #tpu.dot_dimension_numbers<[1], [0], [0], [1], [0, 0, 1, 1], [], []>} : vector<16x32xf32>, vector<32x32xf32>, vector<16x32xf32> -> vector<16x32xf32>
    %c1_113 = arith.constant 1 : index
    %c0_114 = arith.constant 0 : index
    %333 = vector.load %arg11[%c1_113, %c0_114] : memref<2x32xf32, #tpu.memory_space<vmem>>, vector<1x32xf32>
    %334 = vector.shape_cast %333 : vector<1x32xf32> to vector<32xf32>
    %335 = vector.shape_cast %334 : vector<32xf32> to vector<1x32xf32>
    %336 = vector.broadcast %335 : vector<1x32xf32> to vector<16x32xf32>
    %337 = arith.addf %332, %336 : vector<16x32xf32>
    %338 = arith.addf %319, %337 : vector<16x32xf32>
    %c1_115 = arith.constant 1 : index
    %c0_116 = arith.constant 0 : index
    %339 = vector.load %arg12[%c1_115, %c0_116] : memref<2x32xf32, #tpu.memory_space<vmem>>, vector<1x32xf32>
    %340 = vector.shape_cast %339 : vector<1x32xf32> to vector<32xf32>
    %c1_117 = arith.constant 1 : index
    %c0_118 = arith.constant 0 : index
    %341 = vector.load %arg13[%c1_117, %c0_118] : memref<2x32xf32, #tpu.memory_space<vmem>>, vector<1x32xf32>
    %342 = vector.shape_cast %341 : vector<1x32xf32> to vector<32xf32>
    %cst_119 = arith.constant dense<0.000000e+00> : vector<16xf32>
    %343 = vector.multi_reduction <add>, %338, %cst_119 [1] : vector<16x32xf32> to vector<16xf32>
    %344 = vector.shape_cast %343 : vector<16xf32> to vector<16x1xf32>
    %cst_120 = arith.constant 3.200000e+01 : f32
    %345 = vector.broadcast %cst_120 : f32 to vector<16x1xf32>
    %346 = arith.divf %344, %345 : vector<16x1xf32>
    %347 = arith.mulf %338, %338 : vector<16x32xf32>
    %cst_121 = arith.constant dense<0.000000e+00> : vector<16xf32>
    %348 = vector.multi_reduction <add>, %347, %cst_121 [1] : vector<16x32xf32> to vector<16xf32>
    %349 = vector.shape_cast %348 : vector<16xf32> to vector<16x1xf32>
    %cst_122 = arith.constant 3.200000e+01 : f32
    %350 = vector.broadcast %cst_122 : f32 to vector<16x1xf32>
    %351 = arith.divf %349, %350 : vector<16x1xf32>
    %352 = arith.mulf %346, %346 : vector<16x1xf32>
    %353 = arith.subf %351, %352 : vector<16x1xf32>
    %354 = vector.broadcast %346 : vector<16x1xf32> to vector<16x32xf32>
    %355 = arith.subf %338, %354 : vector<16x32xf32>
    %cst_123 = arith.constant 9.99999974E-6 : f32
    %356 = vector.broadcast %cst_123 : f32 to vector<16x1xf32>
    %357 = arith.addf %353, %356 : vector<16x1xf32>
    %358 = math.rsqrt %357 : vector<16x1xf32>
    %359 = vector.broadcast %358 : vector<16x1xf32> to vector<16x32xf32>
    %360 = arith.mulf %355, %359 : vector<16x32xf32>
    %361 = vector.shape_cast %340 : vector<32xf32> to vector<1x32xf32>
    %362 = vector.broadcast %361 : vector<1x32xf32> to vector<16x32xf32>
    %363 = arith.mulf %360, %362 : vector<16x32xf32>
    %364 = vector.shape_cast %342 : vector<32xf32> to vector<1x32xf32>
    %365 = vector.broadcast %364 : vector<1x32xf32> to vector<16x32xf32>
    %366 = arith.addf %363, %365 : vector<16x32xf32>
    %c0_124 = arith.constant 0 : index
    %c0_125 = arith.constant 0 : index
    %367 = vector.load %arg14[%c0_124, %c0_125] : memref<32x128xf32, #tpu.memory_space<vmem>>, vector<32x128xf32>
    %cst_126 = arith.constant dense<0.000000e+00> : vector<16x128xf32>
    %368 = tpu.matmul %366, %367, %cst_126 {dimension_numbers = #tpu.dot_dimension_numbers<[1], [0], [0], [1], [0, 0, 1, 1], [], []>} : vector<16x32xf32>, vector<32x128xf32>, vector<16x128xf32> -> vector<16x128xf32>
    %c0_127 = arith.constant 0 : index
    %c0_128 = arith.constant 0 : index
    %369 = vector.load %arg15[%c0_127, %c0_128] : memref<1x128xf32, #tpu.memory_space<vmem>>, vector<1x128xf32>
    %370 = vector.broadcast %369 : vector<1x128xf32> to vector<16x128xf32>
    %371 = arith.addf %368, %370 : vector<16x128xf32>
    %c0_129 = arith.constant 0 : index
    %c0_130 = arith.constant 0 : index
    %372 = vector.load %arg16[%c0_129, %c0_130] : memref<16x128xf32, #tpu.memory_space<vmem>>, vector<16x128xf32>
    tpu.vector_store %arg16[%c0_129, %c0_130], %371 {strides = array<i32>} : memref<16x128xf32, #tpu.memory_space<vmem>>, vector<16x128xf32>,
    return
  }
}

</mosaic_0001>

<bundles_post_ra>
// kernel: tpu_custom_call.1
= control target key start
LH: loop header
LB: loop body
LE: loop exit
PB: predicated region body
PF: predicated region fallthrough
CT: control target
= control target key end

     0   :  { %s4312_s0 = inlined_call_operand.hbm [shape: f32[16,32], index: 0, kind: input, shape index: {}]   ;;  %s4313_s1 = inlined_call_operand.hbm [shape: f32[16,16], index: 1, kind: input, shape index: {}]   ;;  %s4314_s2 = inlined_call_operand.hbm [shape: f32[2,32,128], index: 2, kind: input, shape index: {}]   ;;  %s4315_s3 = inlined_call_operand.vmem [shape: f32[2,128], index: 3, kind: input, shape index: {}]   ;;  %s4316_s4 = inlined_call_operand.hbm [shape: f32[2,32,32], index: 4, kind: input, shape index: {}]   ;;  %s4317_s5 = inlined_call_operand.vmem [shape: f32[2,32], index: 5, kind: input, shape index: {}]   ;;  %s4318_s6 = inlined_call_operand.vmem [shape: f32[2,32], index: 6, kind: input, shape index: {}]   ;;  %s4319_s7 = inlined_call_operand.vmem [shape: f32[2,32], index: 7, kind: input, shape index: {}]   ;;  %s4320_s8 = inlined_call_operand.hbm [shape: f32[2,32,32], index: 8, kind: input, shape index: {}]   ;;  %s4321_s9 = inlined_call_operand.vmem [shape: f32[2,32], index: 9, kind: input, shape index: {}]   ;;  %s4322_s10 = inlined_call_operand.hbm [shape: f32[2,32,32], index: 10, kind: input, shape index: {}]   ;;  %s4323_s11 = inlined_call_operand.vmem [shape: f32[2,32], index: 11, kind: input, shape index: {}]   ;;  %s4324_s12 = inlined_call_operand.vmem [shape: f32[2,32], index: 12, kind: input, shape index: {}]   ;;  %s4325_s13 = inlined_call_operand.vmem [shape: f32[2,32], index: 13, kind: input, shape index: {}]   ;;  %s4326_s14 = inlined_call_operand.vmem [shape: f32[32,128], index: 14, kind: input, shape index: {}]   ;;  %s4327_s15 = inlined_call_operand.vmem [shape: f32[1,128], index: 15, kind: input, shape index: {}]   ;;  %s4328_s16 = inlined_call_operand.hbm [shape: f32[16,128], index: 16, kind: output, shape index: {}]  }
   0x1   :  { %4331 = sst [smem:[#allocation19_spill]] %s4312_s0 }
   0x2   :  { %4332 = sst [smem:[#allocation20_spill]] %s4328_s16 }
   0x3   :  { %21 = vsyncpa [#allocation3], 0 }
   0x4   :  { %22 = vsyncpa [#allocation6], 0 }
   0x5   :  { %23 = vsyncpa [#allocation9], 0 }
   0x6   :  { %24 = vsyncpa [#allocation12], 0 }
   0x7   :  { %25 = vsyncpa [#allocation4], 0  ;;  %s3689_s21 = smov [#allocation5]   ;;  %s3690_s23 = smov [#allocation8]  }
   0x8   :  { %s43_s22 = sshll.u32 %s3689_s21, 4  ;;  %s69_s24 = sshll.u32 %s3690_s23, 4  ;;  %s44_s22 = int_to_ptr.vmem [resolvable:$true] %s43_s22  ;;  %s3786_s24 = int_to_ptr.vmem [resolvable:$true] %s69_s24 }
   0x9   :  { %s3525_s27 = scalar_lea.hbm %s4313_s1, 256 }
   0xa   :  { %p3526_p0 = scmp.ne.s32.totalorder %s4313_s1, %s3525_s27  ;;  %p3529_p1 = scmp.lt.u32.totalorder %s3525_s27, %s4313_s1 }
   0xc   :  { %p3531_p2 = pnand %p3529_p1, %p3526_p0 }
   0xe   :  { %3534 = shalt.err (!%p3531_p2)
}
   0xf   :  { %s3535_s17 = scalar_lea.vmem %s44_s22, 256  ;;  %p3540_p4 = scmp.lt.s32.totalorder %s44_s22, %s44_s22 }
  0x10   :  { %p3536_p3 = scmp.ne.s32.totalorder %s44_s22, %s3535_s17  ;;  %p3541_p5 = scmp.lt.s32.totalorder %s3535_s17, %s3535_s17 }
  0x12   :  { %p3542_p6 = por %p3541_p5, %p3540_p4 }
  0x14   :  { %p3543_p7 = pnand %p3542_p6, %p3536_p3 }
  0x16   :  { %3546 = shalt.err (!%p3543_p7)
}
  0x17   :  { %s3691_s18 = smov 128   ;;  %s3692_s19 = smov 8  }
  0x18   :  { %49 = dma.hbm_to_vmem [thread:$0]  %s4313_s1, 256, %s44_s22, [#allocation6], %s3691_s18, %s3691_s18, %s3692_s19  }
  0x19   :  { %s3547_s26 = scalar_lea.hbm %s4316_s4, 1024 }
  0x1a   :  { %p3548_p8 = scmp.ne.s32.totalorder %s4316_s4, %s3547_s26  ;;  %p3551_p9 = scmp.lt.u32.totalorder %s3547_s26, %s4316_s4 }
  0x1c   :  { %p3553_p10 = pnand %p3551_p9, %p3548_p8 }
  0x1e   :  { %3556 = shalt.err (!%p3553_p10)
}
  0x1f   :  { %s3557_s0 = scalar_lea.vmem %s3786_s24, 1024  ;;  %p3562_p12 = scmp.lt.s32.totalorder %s3786_s24, %s3786_s24 }
  0x20   :  { %p3558_p11 = scmp.ne.s32.totalorder %s3786_s24, %s3557_s0  ;;  %p3563_p13 = scmp.lt.s32.totalorder %s3557_s0, %s3557_s0 }
  0x22   :  { %p3564_p0 = por %p3563_p13, %p3562_p12 }
  0x24   :  { %p3565_p1 = pnand %p3564_p0, %p3558_p11 }
  0x26   :  { %3568 = shalt.err (!%p3565_p1)
}
  0x27   :  { %75 = dma.hbm_to_vmem [thread:$0]  %s4316_s4, 1024, %s3786_s24, [#allocation9], %s3691_s18, %s3691_s18, %s3692_s19  }
  0x28   :  { %s3693_s17 = smov [#allocation2]   ;;  %s3694_s21 = smov [#allocation7]  }
  0x29   :  { %s31_s20 = sshll.u32 %s3693_s17, 4  ;;  %s55_s23 = sshll.u32 %s3694_s21, 4  ;;  %s32_s20 = int_to_ptr.vmem [resolvable:$true] %s31_s20  ;;  %s3823_s23 = int_to_ptr.vmem [resolvable:$true] %s55_s23 }
  0x2a   :  { %s4333_s27 = sld [smem:[#allocation19_spill]] }
  0x30   :  { %s3569_s28 = scalar_lea.hbm %s4333_s27, 256 }
  0x31   :  { %p3570_p2 = scmp.ne.s32.totalorder %s4333_s27, %s3569_s28  ;;  %p3573_p3 = scmp.lt.u32.totalorder %s3569_s28, %s4333_s27 }
  0x33   :  { %p3575_p4 = pnand %p3573_p3, %p3570_p2 }
  0x35   :  { %3578 = shalt.err (!%p3575_p4)
}
  0x36   :  { %s3579_s4 = scalar_lea.vmem %s32_s20, 256  ;;  %p3584_p6 = scmp.lt.s32.totalorder %s32_s20, %s32_s20 }
  0x37   :  { %p3580_p5 = scmp.ne.s32.totalorder %s32_s20, %s3579_s4  ;;  %p3585_p7 = scmp.lt.s32.totalorder %s3579_s4, %s3579_s4 }
  0x39   :  { %p3586_p8 = por %p3585_p7, %p3584_p6 }
  0x3b   :  { %p3587_p9 = pnand %p3586_p8, %p3580_p5 }
  0x3d   :  { %3590 = shalt.err (!%p3587_p9)
}
  0x3e   :  { %37 = dma.hbm_to_vmem [thread:$0]  %s4333_s27, 256, %s32_s20, [#allocation3], %s3691_s18, %s3691_s18, %s3692_s19  }
  0x3f   :  { %s3591_s16 = scalar_lea.hbm %s4314_s2, 1024 }
  0x40   :  { %p3592_p10 = scmp.ne.s32.totalorder %s4314_s2, %s3591_s16  ;;  %p3595_p11 = scmp.lt.u32.totalorder %s3591_s16, %s4314_s2 }
  0x42   :  { %p3597_p12 = pnand %p3595_p11, %p3592_p10 }
  0x44   :  { %3600 = shalt.err (!%p3597_p12)
}
  0x45   :  { %s3601_s29 = scalar_lea.vmem %s3823_s23, 1024  ;;  %p3606_p0 = scmp.lt.s32.totalorder %s3823_s23, %s3823_s23 }
  0x46   :  { %p3602_p13 = scmp.ne.s32.totalorder %s3823_s23, %s3601_s29  ;;  %p3607_p1 = scmp.lt.s32.totalorder %s3601_s29, %s3601_s29 }
  0x48   :  { %p3608_p2 = por %p3607_p1, %p3606_p0 }
  0x4a   :  { %p3609_p3 = pnand %p3608_p2, %p3602_p13 }
  0x4c   :  { %3612 = shalt.err (!%p3609_p3)
}
  0x4d   :  { %61 = dma.hbm_to_vmem [thread:$0]  %s4314_s2, 1024, %s3823_s23, [#allocation6], %s3691_s18, %s3691_s18, %s3692_s19  }
  0x4e   :  { %s3695_s30 = smov [#allocation10]   ;;  %s3696_s4 = smov [#allocation11]  }
  0x4f   :  { %s87_s0 = sshll.u32 %s3695_s30, 4  ;;  %s101_s24 = sshll.u32 %s3696_s4, 4  ;;  %s88_s0 = int_to_ptr.vmem [resolvable:$true] %s87_s0  ;;  %s3860_s24 = int_to_ptr.vmem [resolvable:$true] %s101_s24 }
  0x50   :  { %s3613_s17 = scalar_lea.hbm %s4320_s8, 1024 }
  0x51   :  { %p3614_p4 = scmp.ne.s32.totalorder %s4320_s8, %s3613_s17  ;;  %p3617_p5 = scmp.lt.u32.totalorder %s3613_s17, %s4320_s8 }
  0x53   :  { %p3619_p6 = pnand %p3617_p5, %p3614_p4 }
  0x55   :  { %3622 = shalt.err (!%p3619_p6)
}
  0x56   :  { %s3623_s2 = scalar_lea.vmem %s88_s0, 1024  ;;  %p3628_p8 = scmp.lt.s32.totalorder %s88_s0, %s88_s0 }
  0x57   :  { %p3624_p7 = scmp.ne.s32.totalorder %s88_s0, %s3623_s2  ;;  %p3629_p9 = scmp.lt.s32.totalorder %s3623_s2, %s3623_s2 }
  0x59   :  { %p3630_p10 = por %p3629_p9, %p3628_p8 }
  0x5b   :  { %p3631_p11 = pnand %p3630_p10, %p3624_p7 }
  0x5d   :  { %3634 = shalt.err (!%p3631_p11)
}
  0x5e   :  { %93 = dma.hbm_to_vmem [thread:$0]  %s4320_s8, 1024, %s88_s0, [#allocation9], %s3691_s18, %s3691_s18, %s3692_s19  }
  0x5f   :  { %s3635_s27 = scalar_lea.hbm %s4322_s10, 1024 }
  0x60   :  { %p3636_p12 = scmp.ne.s32.totalorder %s4322_s10, %s3635_s27  ;;  %p3639_p13 = scmp.lt.u32.totalorder %s3635_s27, %s4322_s10 }
  0x62   :  { %p3641_p0 = pnand %p3639_p13, %p3636_p12 }
  0x64   :  { %3644 = shalt.err (!%p3641_p0)
}
  0x65   :  { %s3645_s17 = scalar_lea.vmem %s3860_s24, 1024  ;;  %p3650_p2 = scmp.lt.s32.totalorder %s3860_s24, %s3860_s24 }
  0x66   :  { %p3646_p1 = scmp.ne.s32.totalorder %s3860_s24, %s3645_s17  ;;  %p3651_p3 = scmp.lt.s32.totalorder %s3645_s17, %s3645_s17 }
  0x68   :  { %p3652_p4 = por %p3651_p3, %p3650_p2 }
  0x6a   :  { %p3653_p5 = pnand %p3652_p4, %p3646_p1 }
  0x6c   :  { %3656 = shalt.err (!%p3653_p5)
}
  0x6d   :  { %107 = dma.hbm_to_vmem [thread:$0]  %s4322_s10, 1024, %s3860_s24, [#allocation12], %s3691_s18, %s3691_s18, %s3692_s19  }
  0x6e   :  { %3679 = dma.done.wait [#allocation3], 256  }
  0x6f   :  { %3680 = vsyncadd [#allocation3], 4294967040 }
  0x70   :  { %3681 = dma.done.wait [#allocation6], 1280  }
  0x71   :  { %3682 = vsyncadd [#allocation6], 4294966016 }
  0x72   :  { %3683 = dma.done.wait [#allocation9], 2048  }
  0x73   :  { %3684 = vsyncadd [#allocation9], 4294965248 }
  0x74   :  { %3685 = dma.done.wait [#allocation12], 1024  }
  0x75   :  { %3686 = vsyncadd [#allocation12], 4294966272  ;;  %vm171_vm0 = vcmask 261120   ;;  %v162_v0 = vld [vmem:[#allocation7] sm:$0xff]  ;;  %v163_v1 = vld [vmem:[#allocation7 + $0x8] sm:$0xff]  ;;  %v140_v8 = vlaneseq  ;;  %v3697_v10 = vmov 0.0  }
  0x76   :  { %v164_v2 = vld [vmem:[#allocation7 + $0x10] sm:$0xff]  ;;  %v3219_v3 = vpack.c.bf16 %v163_v1, %v162_v0  ;;  %v165_v4 = vld [vmem:[#allocation7 + $0x18] sm:$0xff]  ;;  %v3897_v5 = vld [vmem:[#allocation2] sm:$0xff]  ;;  %s3698_s16 = smov 96   ;;  %vm346_vm12 = vcmask 130048   ;;  %s3699_s21 = smov 64  }
  0x77   :  { %v3223_v6 = vpack.c.bf16 %v165_v4, %v164_v2  ;;  %3016 = vmatprep.mubr.msk.f32.mxu0 %vm171_vm0, %v3897_v5  ;;  %v3901_v7 = vld [vmem:[#allocation2 + $0x8] sm:$0xff]  ;;  %v141_v9 = vand.u32 127, %v140_v8  ;;  %v2807_v13 = vld [vmem:[%s4315_s3] ss:$0 sm:$0xff]  ;;  %vm3931_vm11 = vmpackc.low %vm171_vm0, %vm171_vm0 }
  0x78   :  { %3220 = vmatprep.subr.bf16.mxu0 %v3219_v3  ;;  %v3967_v32 = vld [vmem:[#allocation5 + $0x8] sm:$0xff]  ;;  %v3969_v33 = vld [vmem:[#allocation5] sm:$0xff] }
  0x79   :  { %3222 = vmatpush3.bf16.msra.mxu0 %v3219_v3  ;;  %vm152_vm1 = vcmp.ge.s32.totalorder %v141_v9, 16  ;;  %vm153_vm2 = vcmp.lt.s32.totalorder %v141_v9, 24  ;;  %vm157_vm4 = vcmp.ge.s32.totalorder %v141_v9, 24  ;;  %vm158_vm5 = vcmp.lt.s32.totalorder %v141_v9, 32 }
  0x7a   :  { %3224 = vmatprep.subr.bf16.mxu0 %v3223_v6  ;;  %vm154_vm3 = vmand %vm152_vm1, %vm153_vm2  ;;  %vm147_vm7 = vcmp.ge.s32.totalorder %v141_v9, 8  ;;  %vm148_vm8 = vcmp.lt.s32.totalorder %v141_v9, 16  ;;  %vm143_vm9 = vcmp.lt.s32.totalorder %v141_v9, 8 }
  0x7b   :  { %v3905_v11 = vsel %vm154_vm3, 1.0, %v3697_v10  ;;  %vm159_vm6 = vmand %vm157_vm4, %vm158_vm5  ;;  %v3914_v17 = vsel %vm143_vm9, 1.0, %v3697_v10 }
  0x7c   :  { %v3907_v12 = vsel %vm159_vm6, 1.0, %v3697_v10  ;;  %vm149_vm10 = vmand %vm147_vm7, %vm148_vm8 }
  0x7d   :  { %3226 = vmatpush3.bf16.msra.mxu0 %v3223_v6  ;;  %v3916_v18 = vsel %vm149_vm10, 1.0, %v3697_v10 }
  0x80   :  { %3017 = vmatmul.mubr.msk.f32.vlgmr.msra.gmra.mrb[0].mxu0 %vm171_vm0, %v3901_v7 }
 0x153   :  { %v3018_v14 = vpop.f32.mrb[0].mxu0 }
 0x154   :  { %v3912_v15 = vadd.f32 %v3018_v14, %v2807_v13  ;;  %v244_v16 = vpop.f32.mrb[1].mxu0 }
 0x155   :  { %v3918_v19 = vadd.f32 %v2807_v13, %v244_v16 }
 0x156   :  { %v254_v28 = vmul.f32 %v3914_v17, %v3912_v15  ;;  %v376_v29 = vmul.f32 %v3916_v18, %v3912_v15  ;;  %v665_v31 = vmul.f32 %v3905_v11, %v3912_v15 }
 0x157   :  { %v3395_v20 = vpack.i.bf16 %v3912_v15, %v3918_v19  ;;  %v253_v21 = vmul.f32 %v3914_v17, %v3918_v19  ;;  %v375_v22 = vmul.f32 %v3916_v18, %v3918_v19  ;;  %v664_v30 = vmul.f32 %v3905_v11, %v3918_v19 }
 0x159   :  { %3396 = vrot.lane.b32.xlu0 %v3395_v20, %s3698_s16  ;;  %3023 = vmatprep.mubr.msk.f32.mxu1 %vm171_vm0, %v253_v21 }
 0x15a   :  { %3030 = vmatprep.mubr.msk.f32.mxu0 %vm171_vm0, %v375_v22 }
 0x1cb   :  { %v3397_v23 = vpop.permute.xlu0 %3396 }
 0x1cc   :  { %v3399_v24 = vunpack.i.h.bf16 %v3397_v23  ;;  %v3398_v25 = vunpack.i.l.bf16 %v3397_v23 }
 0x1ce   :  { %v3935_v27 = vpack.c.bf16 %v3399_v24, %v3398_v25 }
 0x1d0   :  { %3229 = vmatprep.subr.msk.bf16.mxu1 %vm3931_vm11, %v3935_v27  ;;  %3235 = vmatprep.subr.msk.bf16.mxu0 %vm3931_vm11, %v3935_v27 }
 0x1d1   :  { %3232 = vmatpush3.bf16.xpose.msk.msra.mxu1 %vm3931_vm11, %v3935_v27  ;;  %3238 = vmatpush3.bf16.xpose.msk.msra.mxu0 %vm3931_vm11, %v3935_v27 }
 0x1d2   :  { %3249 = vmatprep.subr.msk.bf16.mxu0 %vm3931_vm11, %v3935_v27 }
 0x1d8   :  { %3024 = vmatmul.mubr.msk.f32.vlgmr.msra.gmra.mrb[0].mxu1 %vm171_vm0, %v254_v28  ;;  %3031 = vmatmul.mubr.msk.f32.vlgmr.msra.gmra.mrb[2].mxu0 %vm171_vm0, %v376_v29 }
 0x1d9   :  { %3252 = vmatpush3.bf16.xpose.msk.msra.mxu0 %vm3931_vm11, %v3935_v27  ;;  %3051 = vmatprep.mubr.msk.f32.mxu0 %vm171_vm0, %v664_v30 }
 0x1e0   :  { %3052 = vmatmul.mubr.msk.f32.vlgmr.msra.gmra.mrb[4].mxu0 %vm171_vm0, %v665_v31 }
 0x2ab   :  { %v3025_v34 = vpop.f32.mrb[0].mxu1  ;;  %v3032_v35 = vpop.f32.mrb[2].mxu0 }
 0x2ac   :  { %v455_v36 = vadd.f32 %v3032_v35, %v3967_v32  ;;  %v337_v37 = vpop.f32.mrb[1].mxu1  ;;  %v449_v38 = vpop.f32.mrb[3].mxu0  ;;  %v343_v40 = vadd.f32 %v3025_v34, %v3967_v32 }
 0x2ad   :  { %v450_v39 = vadd.f32 %v449_v38, %v3969_v33  ;;  %v338_v46 = vadd.f32 %v337_v37, %v3969_v33 }
 0x2ae   :  { %v461_v41 = vsel %vm346_vm12, %v455_v36, -inf  ;;  %v350_v43 = vsel %vm346_vm12, %v343_v40, -inf }
 0x2af   :  { %462 = vmax.xlane.f32.xlu1 %v461_v41  ;;  %v458_v42 = vsel %vm346_vm12, %v450_v39, -inf  ;;  %v347_v48 = vsel %vm346_vm12, %v338_v46, -inf }
 0x2b0   :  { %459 = vmax.xlane.f32.xlu0 %v458_v42 }
 0x2b3   :  { %v3053_v44 = vpop.f32.mrb[4].mxu0  ;;  %351 = vmax.xlane.f32.xlu1 %v350_v43 }
 0x2b4   :  { %v738_v45 = vpop.f32.mrb[5].mxu0  ;;  %v744_v47 = vadd.f32 %v3053_v44, %v3967_v32 }
 0x2b5   :  { %v739_v49 = vadd.f32 %v738_v45, %v3969_v33 }
 0x2b6   :  { %v750_v50 = vsel %vm346_vm12, %v744_v47, -inf }
 0x2b7   :  { %v747_v51 = vsel %vm346_vm12, %v739_v49, -inf }
 0x2c4   :  { %481 = vrot.lane.b32.xlu1 %v3916_v18, %s3699_s21 }
 0x2c6   :  { %370 = vrot.lane.b32.xlu0 %v3914_v17, %s3699_s21 }
 0x2e8   :  { %348 = vmax.xlane.f32.xlu1 %v347_v48 }
 0x2ec   :  { %751 = vmax.xlane.f32.xlu1 %v750_v50 }
 0x2f0   :  { %748 = vmax.xlane.f32.xlu1 %v747_v51 }
 0x301   :  { %770 = vrot.lane.b32.xlu1 %v3905_v11, %s3699_s21 }
 0x33c   :  { %v463_v52 = vpop.xlane.xlu1 %462 }
 0x33d   :  { %v465_v53 = vsub.f32 %v455_v36, %v463_v52  ;;  %v460_v63 = vpop.xlane.xlu0 %459 }
 0x33e   :  { %v464_v0 = vsub.f32 %v450_v39, %v460_v63 }
 0x33f   :  { %v468_v54 = vmul.f32 1.442695, %v465_v53 }
 0x340   :  { %v352_v55 = vpop.xlane.xlu1 %351  ;;  %v466_v2 = vmul.f32 1.442695, %v464_v0 }
 0x341   :  { %3445 = vpow2.f32 %v468_v54  ;;  %v354_v62 = vsub.f32 %v343_v40, %v352_v55  ;;  %v4010_v35 = vpop.permute.xlu0 %370 }
 0x342   :  { %v373_v38 = vmul.f32 %v4010_v35, %v3918_v19  ;;  %v374_v39 = vmul.f32 %v4010_v35, %v3912_v15 }
 0x343   :  { %v357_v1 = vmul.f32 1.442695, %v354_v62 }
 0x344   :  { %v3989_v56 = vpop.permute.xlu1 %481  ;;  %v3405_v41 = vpack.i.bf16 %v374_v39, %v373_v38 }
 0x345   :  { %v484_v57 = vmul.f32 %v3989_v56, %v3918_v19  ;;  %v485_v58 = vmul.f32 %v3989_v56, %v3912_v15  ;;  %3447 = vpow2.f32 %v357_v1 }
 0x346   :  { %3449 = vpow2.f32 %v466_v2 }
 0x347   :  { %v3400_v59 = vpack.i.bf16 %v485_v58, %v484_v57 }
 0x349   :  { %3401 = vrot.lane.b32.xlu1 %v3400_v59, %s3699_s21 }
 0x34b   :  { %v3446_v60 = vpop.eup %3445 }
 0x34c   :  { %v473_v61 = vsel %vm346_vm12, %v3446_v60, 0.0 }
 0x34d   :  { %474 = vadd.xlane.f32.xlu0 %v473_v61 }
 0x34f   :  { %v3997_v3 = vpop.eup %3447 }
 0x350   :  { %v362_v4 = vsel %vm346_vm12, %v3997_v3, 0.0  ;;  %v3450_v6 = vpop.eup %3449 }
 0x351   :  { %v470_v8 = vsel %vm346_vm12, %v3450_v6, 0.0 }
 0x36d   :  { %363 = vadd.xlane.f32.xlu1 %v362_v4 }
 0x371   :  { %471 = vadd.xlane.f32.xlu1 %v470_v8 }
 0x375   :  { %v349_v9 = vpop.xlane.xlu1 %348 }
 0x376   :  { %v353_v10 = vsub.f32 %v338_v46, %v349_v9 }
 0x378   :  { %v355_v13 = vmul.f32 1.442695, %v353_v10 }
 0x379   :  { %v752_v14 = vpop.xlane.xlu1 %751 }
 0x37a   :  { %3451 = vpow2.f32 %v355_v13  ;;  %v754_v16 = vsub.f32 %v744_v47, %v752_v14  ;;  %v866_v14 = vmul.f32 %v3907_v12, %v3918_v19 }
 0x37c   :  { %v757_v20 = vmul.f32 1.442695, %v754_v16 }
 0x37d   :  { %v749_v21 = vpop.xlane.xlu1 %748 }
 0x37e   :  { %3453 = vpow2.f32 %v757_v20  ;;  %v753_v22 = vsub.f32 %v739_v49, %v749_v21 }
 0x380   :  { %v755_v23 = vmul.f32 1.442695, %v753_v22 }
 0x381   :  { %v4008_v34 = vpop.permute.xlu1 %770 }
 0x382   :  { %3455 = vpow2.f32 %v755_v23  ;;  %v773_v36 = vmul.f32 %v4008_v34, %v3918_v19  ;;  %v774_v37 = vmul.f32 %v4008_v34, %v3912_v15 }
 0x384   :  { %v3452_v24 = vpop.eup %3451  ;;  %v3410_v40 = vpack.i.bf16 %v774_v37, %v773_v36 }
 0x385   :  { %v359_v25 = vsel %vm346_vm12, %v3452_v24, 0.0 }
 0x386   :  { %360 = vadd.xlane.f32.xlu1 %v359_v25 }
 0x388   :  { %v4003_v28 = vpop.eup %3453 }
 0x389   :  { %v762_v29 = vsel %vm346_vm12, %v4003_v28, 0.0 }
 0x38a   :  { %763 = vadd.xlane.f32.xlu0 %v762_v29 }
 0x38c   :  { %v3456_v30 = vpop.eup %3455 }
 0x38d   :  { %v759_v31 = vsel %vm346_vm12, %v3456_v30, 0.0 }
 0x38e   :  { %760 = vadd.xlane.f32.xlu1 %v759_v31 }
 0x39f   :  { %3411 = vrot.lane.b32.xlu1 %v3410_v40, %s3699_s21 }
 0x3a0   :  { %3406 = vrot.lane.b32.xlu0 %v3405_v41, %s3699_s21 }
 0x3bb   :  { %v3402_v42 = vpop.permute.xlu1 %3401 }
 0x3bc   :  { %v3404_v43 = vunpack.i.h.bf16 %v3402_v42  ;;  %v3403_v44 = vunpack.i.l.bf16 %v3402_v42 }
 0x3be   :  { %v3239_v45 = vpack.c.bf16 %v3404_v43, %v3403_v44  ;;  %v1068_v44 = vld [vmem:[#allocation8] sm:$0xff] }
 0x3c0   :  { %3240 = vmatprep.subr.bf16.mxu1 %v3239_v45 }
 0x3c1   :  { %3242 = vmatpush3.bf16.msra.mxu1 %v3239_v45  ;;  %v1069_v45 = vld [vmem:[#allocation8 + $0x8] sm:$0xff] }
 0x3da   :  { %v475_v47 = vpop.xlane.xlu0 %474 }
 0x3db   :  { %3457 = vrcp.f32 %v475_v47  ;;  %v3267_v47 = vpack.c.bf16 %v1069_v45, %v1068_v44 }
 0x3dd   :  { %3268 = vmatprep.subr.bf16.mxu0 %v3267_v47 }
 0x3de   :  { %3270 = vmatpush3.bf16.msra.mxu0 %v3267_v47  ;;  %v2837_v47 = vld [vmem:[%s4318_s6] ss:$0 sm:$0xff] }
 0x3e5   :  { %v3458_v49 = vpop.eup %3457 }
 0x3e6   :  { %v479_v52 = vmul.f32 %v3458_v49, %v3446_v60 }
 0x3fa   :  { %v364_v46 = vpop.xlane.xlu1 %363 }
 0x3fe   :  { %v472_v48 = vpop.xlane.xlu1 %471 }
 0x3ff   :  { %3459 = vrcp.f32 %v472_v48  ;;  %v1071_v48 = vld [vmem:[#allocation8 + $0x18] sm:$0xff] }
 0x409   :  { %v3460_v50 = vpop.eup %3459 }
 0x40a   :  { %v478_v51 = vmul.f32 %v3460_v50, %v3450_v6 }
 0x40c   :  { %3037 = vmatprep.mubr.msk.f32.mxu1 %vm346_vm12, %v478_v51 }
 0x40d   :  { %3038 = vmatmul.mubr.msk.f32.vlgmr.msra.gmra.mrb[2].mxu1 %vm346_vm12, %v479_v52 }
 0x413   :  { %v361_v53 = vpop.xlane.xlu1 %360 }
 0x414   :  { %3461 = vrcp.f32 %v361_v53 }
 0x415   :  { %3463 = vrcp.f32 %v364_v46  ;;  %v1070_v46 = vld [vmem:[#allocation8 + $0x10] sm:$0xff] }
 0x416   :  { %v3271_v49 = vpack.c.bf16 %v1071_v48, %v1070_v46 }
 0x417   :  { %v764_v54 = vpop.xlane.xlu0 %763 }
 0x418   :  { %3272 = vmatprep.subr.bf16.mxu0 %v3271_v49 }
 0x419   :  { %3274 = vmatpush3.bf16.msra.mxu0 %v3271_v49  ;;  %v2838_v49 = vld [vmem:[%s4319_s7] ss:$0 sm:$0xff] }
 0x41b   :  { %v3407_v55 = vpop.permute.xlu0 %3406  ;;  %v761_v57 = vpop.xlane.xlu1 %760 }
 0x41c   :  { %v3409_v58 = vunpack.i.h.bf16 %v3407_v55  ;;  %v3408_v59 = vunpack.i.l.bf16 %v3407_v55  ;;  %3465 = vrcp.f32 %v761_v57 }
 0x41d   :  { %3467 = vrcp.f32 %v764_v54 }
 0x41e   :  { %v3462_v61 = vpop.eup %3461  ;;  %v3243_v62 = vpack.c.bf16 %v3409_v58, %v3408_v59 }
 0x41f   :  { %v3464_v63 = vpop.eup %3463  ;;  %v3412_v0 = vpop.permute.xlu1 %3411  ;;  %v367_v1 = vmul.f32 %v3462_v61, %v3452_v24 }
 0x420   :  { %v3414_v60 = vunpack.i.h.bf16 %v3412_v0  ;;  %v3413_v2 = vunpack.i.l.bf16 %v3412_v0  ;;  %3244 = vmatprep.subr.bf16.mxu1 %v3243_v62  ;;  %v368_v4 = vmul.f32 %v3464_v63, %v3997_v3  ;;  %v867_v3 = vmul.f32 %v3907_v12, %v3912_v15 }
 0x421   :  { %3246 = vmatpush3.bf16.msra.mxu1 %v3243_v62  ;;  %3044 = vmatprep.mubr.msk.f32.mxu1 %vm346_vm12, %v367_v1  ;;  %v2834_v62 = vld [vmem:[%s4317_s5] ss:$0 sm:$0xff] }
 0x422   :  { %v3253_v6 = vpack.c.bf16 %v3414_v60, %v3413_v2 }
 0x424   :  { %3045 = vmatmul.mubr.msk.f32.vlgmr.msra.gmra.mrb[2].mxu1 %vm346_vm12, %v368_v4  ;;  %3254 = vmatprep.subr.bf16.mxu1 %v3253_v6 }
 0x425   :  { %3256 = vmatpush3.bf16.msra.mxu1 %v3253_v6 }
 0x426   :  { %v3466_v8 = vpop.eup %3465  ;;  %3259 = vmatprep.subr.msk.bf16.mxu1 %vm3931_vm11, %v3935_v27 }
 0x427   :  { %v3468_v9 = vpop.eup %3467  ;;  %v767_v10 = vmul.f32 %v3466_v8, %v3456_v30 }
 0x428   :  { %v768_v13 = vmul.f32 %v3468_v9, %v4003_v28 }
 0x429   :  { %3058 = vmatprep.mubr.msk.f32.mxu1 %vm346_vm12, %v767_v10 }
 0x42c   :  { %3059 = vmatmul.mubr.msk.f32.vlgmr.msra.gmra.mrb[2].mxu1 %vm346_vm12, %v768_v13 }
 0x42d   :  { %3065 = vmatprep.mubr.msk.f32.mxu1 %vm171_vm0, %v866_v14 }
 0x42e   :  { %3262 = vmatpush3.bf16.xpose.msk.msra.mxu1 %vm3931_vm11, %v3935_v27 }
 0x435   :  { %3066 = vmatmul.mubr.msk.f32.vlgmr.msra.gmra.mrb[4].mxu1 %vm171_vm0, %v867_v3  ;;  %v1205_v3 = vld [vmem:[#allocation10] sm:$0xff] }
 0x508   :  { %v3067_v16 = vpop.f32.mrb[4].mxu1 }
 0x509   :  { %v946_v20 = vadd.f32 %v3067_v16, %v3967_v32  ;;  %v940_v21 = vpop.f32.mrb[5].mxu1  ;;  %v1206_v16 = vld [vmem:[#allocation10 + $0x8] sm:$0xff] }
 0x50a   :  { %v941_v22 = vadd.f32 %v940_v21, %v3969_v33  ;;  %v1208_v21 = vld [vmem:[#allocation10 + $0x18] sm:$0xff] }
 0x50b   :  { %v952_v23 = vsel %vm346_vm12, %v946_v20, -inf }
 0x50c   :  { %953 = vmax.xlane.f32.xlu0 %v952_v23  ;;  %v949_v24 = vsel %vm346_vm12, %v941_v22, -inf  ;;  %v1298_v23 = vld [vmem:[#allocation11 + $0x8] sm:$0xff] }
 0x50d   :  { %950 = vmax.xlane.f32.xlu1 %v949_v24 }
 0x522   :  { %972 = vrot.lane.b32.xlu0 %v3907_v12, %s3699_s21 }
 0x599   :  { %v954_v27 = vpop.xlane.xlu0 %953 }
 0x59a   :  { %v956_v25 = vsub.f32 %v946_v20, %v954_v27  ;;  %v951_v28 = vpop.xlane.xlu1 %950  ;;  %v1207_v20 = vld [vmem:[#allocation10 + $0x10] sm:$0xff] }
 0x59b   :  { %v955_v29 = vsub.f32 %v941_v22, %v951_v28  ;;  %v1297_v22 = vld [vmem:[#allocation11] sm:$0xff] }
 0x59c   :  { %v959_v30 = vmul.f32 1.442695, %v956_v25  ;;  %v3283_v24 = vpack.c.bf16 %v1298_v23, %v1297_v22  ;;  %v1435_v22 = vld [vmem:[#allocation7 + $0x28] sm:$0xff]  ;;  %v1436_v23 = vld [vmem:[#allocation7 + $0x30] sm:$0xff] }
 0x59d   :  { %v957_v31 = vmul.f32 1.442695, %v955_v29  ;;  %v4050_v40 = vpop.permute.xlu0 %972 }
 0x59e   :  { %3469 = vpow2.f32 %v959_v30  ;;  %v975_v41 = vmul.f32 %v4050_v40, %v3918_v19  ;;  %v976_v42 = vmul.f32 %v4050_v40, %v3912_v15 }
 0x59f   :  { %3471 = vpow2.f32 %v957_v31 }
 0x5a0   :  { %v3415_v43 = vpack.i.bf16 %v976_v42, %v975_v41 }
 0x5a8   :  { %v3470_v36 = vpop.eup %3469 }
 0x5a9   :  { %v964_v37 = vsel %vm346_vm12, %v3470_v36, 0.0  ;;  %v3472_v38 = vpop.eup %3471 }
 0x5aa   :  { %965 = vadd.xlane.f32.xlu1 %v964_v37  ;;  %v961_v39 = vsel %vm346_vm12, %v3472_v38, 0.0 }
 0x5ae   :  { %962 = vadd.xlane.f32.xlu1 %v961_v39 }
 0x5bf   :  { %3416 = vrot.lane.b32.xlu1 %v3415_v43, %s3699_s21 }
 0x637   :  { %v966_v50 = vpop.xlane.xlu1 %965 }
 0x638   :  { %3473 = vrcp.f32 %v966_v50 }
 0x63b   :  { %v963_v51 = vpop.xlane.xlu1 %962 }
 0x63c   :  { %3475 = vrcp.f32 %v963_v51 }
 0x63f   :  { %v3417_v19 = vpop.permute.xlu1 %3416 }
 0x640   :  { %v3419_v52 = vunpack.i.h.bf16 %v3417_v19  ;;  %v3418_v15 = vunpack.i.l.bf16 %v3417_v19 }
 0x642   :  { %v3263_v53 = vpack.c.bf16 %v3419_v52, %v3418_v15  ;;  %v3474_v54 = vpop.eup %3473 }
 0x643   :  { %v970_v58 = vmul.f32 %v3474_v54, %v3470_v36 }
 0x644   :  { %3264 = vmatprep.subr.bf16.mxu1 %v3263_v53 }
 0x645   :  { %3266 = vmatpush3.bf16.msra.mxu1 %v3263_v53 }
 0x646   :  { %v3476_v55 = vpop.eup %3475  ;;  %3284 = vmatprep.subr.bf16.mxu1 %v3283_v24 }
 0x647   :  { %v969_v57 = vmul.f32 %v3476_v55, %v3472_v38  ;;  %v1299_v55 = vld [vmem:[#allocation11 + $0x10] sm:$0xff] }
 0x649   :  { %3072 = vmatprep.mubr.msk.f32.mxu1 %vm346_vm12, %v969_v57  ;;  %v1300_v57 = vld [vmem:[#allocation11 + $0x18] sm:$0xff] }
 0x64a   :  { %3073 = vmatmul.mubr.msk.f32.vlgmr.msra.gmra.mrb[2].mxu1 %vm346_vm12, %v970_v58  ;;  %v3287_v58 = vpack.c.bf16 %v1300_v57, %v1299_v55 }
 0x64b   :  { %3286 = vmatpush3.bf16.msra.mxu1 %v3283_v24 }
 0x64c   :  { %3288 = vmatprep.subr.bf16.mxu1 %v3287_v58 }
 0x64f   :  { %3290 = vmatpush3.bf16.msra.mxu1 %v3287_v58  ;;  %v2847_v58 = vld [vmem:[%s4315_s3 + $0x1] ss:$0 sm:$0xff] }
 0x71d   :  { %v3074_v59 = vpop.f32.mrb[2].mxu1 }
 0x71e   :  { %v1057_v61 = vpop.f32.mrb[3].mxu1 }
 0x71f   :  { %3083 = vmatprep.mubr.msk.f32.mxu0 %vm171_vm0, %v1057_v61 }
 0x720   :  { %3084 = vmatmul.mubr.msk.f32.vlgmr.msra.gmra.mrb[6].mxu0 %vm171_vm0, %v3074_v59  ;;  %v2839_v59 = vld [vmem:[%s4321_s9] ss:$0 sm:$0xff] }
 0x7f3   :  { %v3085_v63 = vpop.f32.mrb[6].mxu0 }
 0x7f4   :  { %v1155_v0 = vadd.f32 %v3085_v63, %v2834_v62  ;;  %v1149_v1 = vpop.f32.mrb[7].mxu0 }
 0x7f5   :  { %v1150_v60 = vadd.f32 %v2834_v62, %v1149_v1 }
 0x7f6   :  { %v1159_v2 = vadd.f32 %v1155_v0, %v3901_v7  ;;  %v3275_v7 = vpack.c.bf16 %v1206_v16, %v1205_v3 }
 0x7f7   :  { %v1158_v4 = vadd.f32 %v1150_v60, %v3897_v5  ;;  %v3279_v5 = vpack.c.bf16 %v1208_v21, %v1207_v20 }
 0x7f8   :  { %v1165_v6 = vsel %vm171_vm0, %v1159_v2, 0.0  ;;  %v1172_v13 = vmul.f32 %v1159_v2, %v1159_v2  ;;  %3276 = vmatprep.subr.bf16.mxu0 %v3275_v7 }
 0x7f9   :  { %1166 = vadd.xlane.f32.xlu1 %v1165_v6  ;;  %v1162_v8 = vsel %vm171_vm0, %v1158_v4, 0.0  ;;  %v1171_v9 = vmul.f32 %v1158_v4, %v1158_v4  ;;  %3278 = vmatpush3.bf16.msra.mxu0 %v3275_v7 }
 0x7fa   :  { %1163 = vadd.xlane.f32.xlu0 %v1162_v8  ;;  %v1176_v14 = vsel %vm171_vm0, %v1172_v13, 0.0  ;;  %3280 = vmatprep.subr.bf16.mxu0 %v3279_v5 }
 0x7fb   :  { %v1173_v10 = vsel %vm171_vm0, %v1171_v9, 0.0 }
 0x7fd   :  { %3282 = vmatpush3.bf16.msra.mxu0 %v3279_v5  ;;  %v1434_v5 = vld [vmem:[#allocation7 + $0x20] sm:$0xff] }
 0x7fe   :  { %1174 = vadd.xlane.f32.xlu0 %v1173_v10  ;;  %v3291_v24 = vpack.c.bf16 %v1435_v22, %v1434_v5 }
 0x800   :  { %3292 = vmatprep.subr.bf16.mxu0 %v3291_v24 }
 0x802   :  { %1177 = vadd.xlane.f32.xlu0 %v1176_v14 }
 0x886   :  { %v1167_v28 = vpop.xlane.xlu1 %1166 }
 0x887   :  { %v1164_v27 = vpop.xlane.xlu0 %1163  ;;  %v1170_v30 = vmul.f32 0.03125, %v1167_v28 }
 0x888   :  { %v1169_v25 = vmul.f32 0.03125, %v1164_v27  ;;  %v1437_v27 = vld [vmem:[#allocation7 + $0x38] sm:$0xff] }
 0x889   :  { %v1182_v39 = vmul.f32 %v1170_v30, %v1170_v30  ;;  %v1186_v50 = vsub.f32 %v1159_v2, %v1170_v30  ;;  %v2842_v2 = vld [vmem:[%s4323_s11] ss:$0 sm:$0xff] }
 0x88a   :  { %v1181_v31 = vmul.f32 %v1169_v25, %v1169_v25  ;;  %v1185_v45 = vsub.f32 %v1158_v4, %v1169_v25  ;;  %v3295_v25 = vpack.c.bf16 %v1437_v27, %v1436_v23 }
 0x88b   :  { %v1175_v29 = vpop.xlane.xlu0 %1174 }
 0x88c   :  { %v1179_v36 = vmul.f32 0.03125, %v1175_v29 }
 0x88e   :  { %v1183_v37 = vsub.f32 %v1179_v36, %v1181_v31 }
 0x88f   :  { %v1178_v38 = vpop.xlane.xlu0 %1177 }
 0x890   :  { %v1187_v41 = vadd.f32 1e-05, %v1183_v37  ;;  %v1180_v42 = vmul.f32 0.03125, %v1178_v38 }
 0x892   :  { %3477 = vrsqrt.f32 %v1187_v41  ;;  %v1184_v43 = vsub.f32 %v1180_v42, %v1182_v39 }
 0x894   :  { %v1188_v44 = vadd.f32 1e-05, %v1184_v43 }
 0x896   :  { %3479 = vrsqrt.f32 %v1188_v44 }
 0x89c   :  { %v3478_v46 = vpop.eup %3477 }
 0x89d   :  { %v1191_v48 = vmul.f32 %v3478_v46, %v1185_v45 }
 0x89f   :  { %v1197_v51 = vmul.f32 %v2837_v47, %v1191_v48 }
 0x8a0   :  { %v3480_v19 = vpop.eup %3479 }
 0x8a1   :  { %v1192_v52 = vmul.f32 %v3480_v19, %v1186_v50  ;;  %v1203_v15 = vadd.f32 %v2838_v49, %v1197_v51  ;;  %v2845_v50 = vld [vmem:[%s4324_s12] ss:$0 sm:$0xff] }
 0x8a3   :  { %v1198_v53 = vmul.f32 %v2837_v47, %v1192_v52  ;;  %3094 = vmatprep.mubr.msk.f32.mxu0 %vm171_vm0, %v1203_v15 }
 0x8a5   :  { %v1204_v54 = vadd.f32 %v2838_v49, %v1198_v53 }
 0x8a7   :  { %3095 = vmatmul.mubr.msk.f32.vlgmr.msra.gmra.mrb[8].mxu0 %vm171_vm0, %v1204_v54 }
 0x8a8   :  { %3294 = vmatpush3.bf16.msra.mxu0 %v3291_v24 }
 0x8a9   :  { %3296 = vmatprep.subr.bf16.mxu0 %v3295_v25 }
 0x8ac   :  { %3298 = vmatpush3.bf16.msra.mxu0 %v3295_v25 }
 0x97a   :  { %v3096_v61 = vpop.f32.mrb[8].mxu0 }
 0x97b   :  { %v1292_v62 = vadd.f32 %v3096_v61, %v2839_v59  ;;  %v1286_v63 = vpop.f32.mrb[9].mxu0 }
 0x97c   :  { %v1287_v0 = vadd.f32 %v2839_v59, %v1286_v63 }
 0x97d   :  { %v1296_v60 = vmax.f32 %v1292_v62, 0.0 }
 0x97e   :  { %v1295_v1 = vmax.f32 %v1287_v0, 0.0 }
 0x980   :  { %3105 = vmatprep.mubr.msk.f32.mxu1 %vm171_vm0, %v1295_v1 }
 0x981   :  { %3106 = vmatmul.mubr.msk.f32.vlgmr.msra.gmra.mrb[6].mxu1 %vm171_vm0, %v1296_v60 }
 0xa54   :  { %v3107_v4 = vpop.f32.mrb[6].mxu1 }
 0xa55   :  { %v1384_v6 = vadd.f32 %v3107_v4, %v2842_v2  ;;  %v1378_v8 = vpop.f32.mrb[7].mxu1 }
 0xa56   :  { %v1379_v9 = vadd.f32 %v2842_v2, %v1378_v8 }
 0xa57   :  { %v1388_v10 = vadd.f32 %v1384_v6, %v1204_v54 }
 0xa58   :  { %v1387_v13 = vadd.f32 %v1379_v9, %v1203_v15  ;;  %v2846_v15 = vld [vmem:[%s4325_s13] ss:$0 sm:$0xff] }
 0xa59   :  { %v1394_v14 = vsel %vm171_vm0, %v1388_v10, 0.0  ;;  %v1400_v3 = vmul.f32 %v1388_v10, %v1388_v10 }
 0xa5a   :  { %1395 = vadd.xlane.f32.xlu1 %v1394_v14  ;;  %v1391_v16 = vsel %vm171_vm0, %v1387_v13, 0.0  ;;  %v1399_v20 = vmul.f32 %v1387_v13, %v1387_v13 }
 0xa5b   :  { %1392 = vadd.xlane.f32.xlu0 %v1391_v16  ;;  %v1404_v7 = vsel %vm171_vm0, %v1400_v3, 0.0 }
 0xa5c   :  { %v1401_v21 = vsel %vm171_vm0, %v1399_v20, 0.0 }
 0xa5e   :  { %1405 = vadd.xlane.f32.xlu1 %v1404_v7 }
 0xa5f   :  { %1402 = vadd.xlane.f32.xlu0 %v1401_v21 }
 0xae7   :  { %v1396_v28 = vpop.xlane.xlu1 %1395 }
 0xae8   :  { %v1398_v29 = vmul.f32 0.03125, %v1396_v28  ;;  %v1393_v30 = vpop.xlane.xlu0 %1392 }
 0xae9   :  { %v1397_v31 = vmul.f32 0.03125, %v1393_v30 }
 0xaea   :  { %v1410_v37 = vmul.f32 %v1398_v29, %v1398_v29  ;;  %v1414_v47 = vsub.f32 %v1388_v10, %v1398_v29 }
 0xaeb   :  { %v1406_v36 = vpop.xlane.xlu1 %1405  ;;  %v1409_v41 = vmul.f32 %v1397_v31, %v1397_v31  ;;  %v1413_v49 = vsub.f32 %v1387_v13, %v1397_v31 }
 0xaec   :  { %v1408_v38 = vmul.f32 0.03125, %v1406_v36  ;;  %v1403_v39 = vpop.xlane.xlu0 %1402 }
 0xaed   :  { %v1407_v42 = vmul.f32 0.03125, %v1403_v39 }
 0xaee   :  { %v1412_v43 = vsub.f32 %v1408_v38, %v1410_v37 }
 0xaef   :  { %v1411_v44 = vsub.f32 %v1407_v42, %v1409_v41 }
 0xaf0   :  { %v1416_v45 = vadd.f32 1e-05, %v1412_v43 }
 0xaf1   :  { %v1415_v46 = vadd.f32 1e-05, %v1411_v44 }
 0xaf2   :  { %3481 = vrsqrt.f32 %v1416_v45 }
 0xaf3   :  { %3483 = vrsqrt.f32 %v1415_v46 }
 0xafc   :  { %v3482_v48 = vpop.eup %3481 }
 0xafd   :  { %v3484_v51 = vpop.eup %3483  ;;  %v1420_v19 = vmul.f32 %v3482_v48, %v1414_v47 }
 0xafe   :  { %v1419_v52 = vmul.f32 %v3484_v51, %v1413_v49 }
 0xaff   :  { %v1426_v53 = vmul.f32 %v2845_v50, %v1420_v19 }
 0xb00   :  { %v1425_v54 = vmul.f32 %v2845_v50, %v1419_v52 }
 0xb01   :  { %v4098_v57 = vadd.f32 %v2846_v15, %v1426_v53 }
 0xb02   :  { %v4096_v55 = vadd.f32 %v2846_v15, %v1425_v54 }
 0xb04   :  { %3116 = vmatprep.mubr.msk.f32.mxu0 %vm171_vm0, %v4096_v55 }
 0xb05   :  { %3117 = vmatmul.mubr.msk.f32.vlgmr.msra.gmra.mrb[10].mxu0 %vm171_vm0, %v4098_v57 }
 0xbd8   :  { %v3118_v59 = vpop.f32.mrb[10].mxu0 }
 0xbd9   :  { %v4107_v61 = vadd.f32 %v3118_v59, %v2847_v58  ;;  %v1515_v62 = vpop.f32.mrb[11].mxu0 }
 0xbda   :  { %v4109_v63 = vadd.f32 %v2847_v58, %v1515_v62 }
 0xbdb   :  { %v1747_v0 = vmul.f32 %v4107_v61, %v3989_v56  ;;  %v4127_v8 = vmul.f32 %v4107_v61, %v4010_v35  ;;  %v4137_v10 = vmul.f32 %v4107_v61, %v4008_v34  ;;  %v4148_v14 = vmul.f32 %v4107_v61, %v4050_v40 }
 0xbdc   :  { %v3420_v1 = vpack.i.bf16 %v4107_v61, %v4109_v63  ;;  %v1524_v60 = vmul.f32 %v3914_v17, %v4109_v63  ;;  %v1641_v2 = vmul.f32 %v3916_v18, %v4109_v63  ;;  %v1746_v4 = vmul.f32 %v4109_v63, %v3989_v56 }
 0xbdd   :  { %v4123_v6 = vmul.f32 %v4109_v63, %v4010_v35  ;;  %v4131_v9 = vmul.f32 %v4109_v63, %v4008_v34  ;;  %v4144_v35 = vmul.f32 %v4109_v63, %v4050_v40  ;;  %v1525_v40 = vmul.f32 %v3914_v17, %v4107_v61 }
 0xbde   :  { %3421 = vrot.lane.b32.xlu0 %v3420_v1, %s3698_s16  ;;  %3123 = vmatprep.mubr.msk.f32.mxu1 %vm171_vm0, %v1524_v60  ;;  %v3425_v56 = vpack.i.bf16 %v1747_v0, %v1746_v4  ;;  %v1642_v5 = vmul.f32 %v3916_v18, %v4107_v61  ;;  %v1926_v22 = vmul.f32 %v3905_v11, %v4109_v63 }
 0xbdf   :  { %3130 = vmatprep.mubr.msk.f32.mxu0 %vm171_vm0, %v1641_v2  ;;  %v3430_v13 = vpack.i.bf16 %v4127_v8, %v4123_v6  ;;  %v3435_v3 = vpack.i.bf16 %v4137_v10, %v4131_v9  ;;  %v3440_v34 = vpack.i.bf16 %v4148_v14, %v4144_v35  ;;  %v1927_v23 = vmul.f32 %v3905_v11, %v4107_v61 }
 0xc50   :  { %v3422_v16 = vpop.permute.xlu0 %3421 }
 0xc51   :  { %v3424_v20 = vunpack.i.h.bf16 %v3422_v16  ;;  %v3423_v7 = vunpack.i.l.bf16 %v3422_v16 }
 0xc53   :  { %v4154_v21 = vpack.c.bf16 %v3424_v20, %v3423_v7 }
 0xc55   :  { %3301 = vmatprep.subr.msk.bf16.mxu1 %vm3931_vm11, %v4154_v21  ;;  %3307 = vmatprep.subr.msk.bf16.mxu0 %vm3931_vm11, %v4154_v21 }
 0xc56   :  { %3304 = vmatpush3.bf16.xpose.msk.msra.mxu1 %vm3931_vm11, %v4154_v21  ;;  %3310 = vmatpush3.bf16.xpose.msk.msra.mxu0 %vm3931_vm11, %v4154_v21 }
 0xc57   :  { %3321 = vmatprep.subr.msk.bf16.mxu0 %vm3931_vm11, %v4154_v21 }
 0xc5d   :  { %3124 = vmatmul.mubr.msk.f32.vlgmr.msra.gmra.mrb[8].mxu1 %vm171_vm0, %v1525_v40  ;;  %3131 = vmatmul.mubr.msk.f32.vlgmr.msra.gmra.mrb[12].mxu0 %vm171_vm0, %v1642_v5 }
 0xc5e   :  { %3324 = vmatpush3.bf16.xpose.msk.msra.mxu0 %vm3931_vm11, %v4154_v21  ;;  %3151 = vmatprep.mubr.msk.f32.mxu0 %vm171_vm0, %v1926_v22 }
 0xc65   :  { %3152 = vmatmul.mubr.msk.f32.vlgmr.msra.gmra.mrb[14].mxu0 %vm171_vm0, %v1927_v23 }
 0xd30   :  { %v3125_v17 = vpop.f32.mrb[8].mxu1  ;;  %v3132_v18 = vpop.f32.mrb[12].mxu0 }
 0xd31   :  { %v1721_v24 = vadd.f32 %v3132_v18, %v3967_v32  ;;  %v1608_v27 = vpop.f32.mrb[9].mxu1  ;;  %v1715_v25 = vpop.f32.mrb[13].mxu0  ;;  %v1614_v30 = vadd.f32 %v3125_v17, %v3967_v32 }
 0xd32   :  { %v1716_v28 = vadd.f32 %v1715_v25, %v3969_v33  ;;  %v1609_v37 = vadd.f32 %v1608_v27, %v3969_v33 }
 0xd33   :  { %v1727_v29 = vsel %vm346_vm12, %v1721_v24, -inf  ;;  %v1620_v38 = vsel %vm346_vm12, %v1614_v30, -inf }
 0xd34   :  { %1728 = vmax.xlane.f32.xlu1 %v1727_v29  ;;  %v1724_v31 = vsel %vm346_vm12, %v1716_v28, -inf  ;;  %v1617_v41 = vsel %vm346_vm12, %v1609_v37, -inf }
 0xd38   :  { %v3153_v36 = vpop.f32.mrb[14].mxu0  ;;  %1725 = vmax.xlane.f32.xlu1 %v1724_v31 }
 0xd39   :  { %v2000_v11 = vpop.f32.mrb[15].mxu0  ;;  %v2006_v39 = vadd.f32 %v3153_v36, %v3967_v32 }
 0xd3a   :  { %v2001_v42 = vadd.f32 %v2000_v11, %v3969_v33 }
 0xd3b   :  { %v2012_v43 = vsel %vm346_vm12, %v2006_v39, -inf }
 0xd3c   :  { %1621 = vmax.xlane.f32.xlu1 %v1620_v38  ;;  %v2009_v44 = vsel %vm346_vm12, %v2001_v42, -inf }
 0xd40   :  { %1618 = vmax.xlane.f32.xlu1 %v1617_v41 }
 0xd44   :  { %2013 = vmax.xlane.f32.xlu1 %v2012_v43 }
 0xd48   :  { %2010 = vmax.xlane.f32.xlu1 %v2009_v44 }
 0xd59   :  { %3426 = vrot.lane.b32.xlu1 %v3425_v56, %s3699_s21 }
 0xdc1   :  { %v1729_v45 = vpop.xlane.xlu1 %1728 }
 0xdc2   :  { %v1731_v46 = vsub.f32 %v1721_v24, %v1729_v45 }
 0xdc4   :  { %v1734_v47 = vmul.f32 1.442695, %v1731_v46 }
 0xdc5   :  { %v1726_v48 = vpop.xlane.xlu1 %1725 }
 0xdc6   :  { %3485 = vpow2.f32 %v1734_v47  ;;  %v1730_v49 = vsub.f32 %v1716_v28, %v1726_v48 }
 0xdc8   :  { %v1732_v50 = vmul.f32 1.442695, %v1730_v49 }
 0xdc9   :  { %v1622_v51 = vpop.xlane.xlu1 %1621 }
 0xdca   :  { %3487 = vpow2.f32 %v1732_v50  ;;  %v1624_v19 = vsub.f32 %v1614_v30, %v1622_v51 }
 0xdcc   :  { %v1627_v52 = vmul.f32 1.442695, %v1624_v19 }
 0xdcd   :  { %v1619_v15 = vpop.xlane.xlu1 %1618 }
 0xdce   :  { %3489 = vpow2.f32 %v1627_v52  ;;  %v1623_v53 = vsub.f32 %v1609_v37, %v1619_v15  ;;  %v2124_v52 = vmul.f32 %v3907_v12, %v4109_v63  ;;  %v2125_v15 = vmul.f32 %v3907_v12, %v4107_v61 }
 0xdd0   :  { %v3486_v54 = vpop.eup %3485  ;;  %v1625_v58 = vmul.f32 1.442695, %v1623_v53 }
 0xdd1   :  { %v2014_v59 = vpop.xlane.xlu1 %2013  ;;  %v1739_v62 = vsel %vm346_vm12, %v3486_v54, 0.0 }
 0xdd2   :  { %3491 = vpow2.f32 %v1625_v58  ;;  %v2016_v0 = vsub.f32 %v2006_v39, %v2014_v59  ;;  %1740 = vadd.xlane.f32.xlu1 %v1739_v62 }
 0xdd4   :  { %v3488_v1 = vpop.eup %3487  ;;  %v2019_v60 = vmul.f32 1.442695, %v2016_v0 }
 0xdd5   :  { %v2011_v2 = vpop.xlane.xlu1 %2010  ;;  %v1736_v4 = vsel %vm346_vm12, %v3488_v1, 0.0 }
 0xdd6   :  { %3493 = vpow2.f32 %v2019_v60  ;;  %v2015_v56 = vsub.f32 %v2001_v42, %v2011_v2  ;;  %1737 = vadd.xlane.f32.xlu0 %v1736_v4  ;;  %v2323_v4 = vld [vmem:[#allocation8 + $0x20] sm:$0xff] }
 0xdd8   :  { %v3490_v16 = vpop.eup %3489  ;;  %v2017_v20 = vmul.f32 1.442695, %v2015_v56  ;;  %v2324_v56 = vld [vmem:[#allocation8 + $0x28] sm:$0xff] }
 0xdd9   :  { %v3427_v7 = vpop.permute.xlu1 %3426  ;;  %v1632_v40 = vsel %vm346_vm12, %v3490_v16, 0.0 }
 0xdda   :  { %3495 = vpow2.f32 %v2017_v20  ;;  %v3429_v5 = vunpack.i.h.bf16 %v3427_v7  ;;  %v3428_v22 = vunpack.i.l.bf16 %v3427_v7  ;;  %1633 = vadd.xlane.f32.xlu1 %v1632_v40  ;;  %v3339_v20 = vpack.c.bf16 %v2324_v56, %v2323_v4  ;;  %v2326_v7 = vld [vmem:[#allocation8 + $0x38] sm:$0xff] }
 0xddc   :  { %v3492_v23 = vpop.eup %3491  ;;  %v3311_v17 = vpack.c.bf16 %v3429_v5, %v3428_v22  ;;  %3340 = vmatprep.subr.bf16.mxu0 %v3339_v20 }
 0xddd   :  { %v1629_v18 = vsel %vm346_vm12, %v3492_v23, 0.0  ;;  %3342 = vmatpush3.bf16.msra.mxu0 %v3339_v20  ;;  %v2556_v20 = vld [vmem:[#allocation11 + $0x38] sm:$0xff] }
 0xdde   :  { %1630 = vadd.xlane.f32.xlu1 %v1629_v18  ;;  %3312 = vmatprep.subr.bf16.mxu1 %v3311_v17 }
 0xddf   :  { %3314 = vmatpush3.bf16.msra.mxu1 %v3311_v17 }
 0xde0   :  { %v3494_v24 = vpop.eup %3493 }
 0xde1   :  { %v2024_v27 = vsel %vm346_vm12, %v3494_v24, 0.0 }
 0xde2   :  { %2025 = vadd.xlane.f32.xlu1 %v2024_v27 }
 0xde4   :  { %v3496_v25 = vpop.eup %3495 }
 0xde5   :  { %v2021_v28 = vsel %vm346_vm12, %v3496_v25, 0.0 }
 0xde6   :  { %2022 = vadd.xlane.f32.xlu1 %v2021_v28 }
 0xdec   :  { %3431 = vrot.lane.b32.xlu0 %v3430_v13, %s3699_s21 }
 0xdf7   :  { %3436 = vrot.lane.b32.xlu1 %v3435_v3, %s3699_s21 }
 0xe5f   :  { %v1741_v29 = vpop.xlane.xlu1 %1740 }
 0xe60   :  { %3497 = vrcp.f32 %v1741_v29  ;;  %v2874_v29 = vld [vmem:[%s4317_s5 + $0x1] ss:$0 sm:$0xff] }
 0xe63   :  { %v1738_v30 = vpop.xlane.xlu0 %1737 }
 0xe64   :  { %3499 = vrcp.f32 %v1738_v30 }
 0xe67   :  { %v3432_v31 = vpop.permute.xlu0 %3431  ;;  %v1634_v36 = vpop.xlane.xlu1 %1633 }
 0xe68   :  { %v3434_v11 = vunpack.i.h.bf16 %v3432_v31  ;;  %v3433_v37 = vunpack.i.l.bf16 %v3432_v31  ;;  %3501 = vrcp.f32 %v1634_v36 }
 0xe6a   :  { %v3315_v38 = vpack.c.bf16 %v3434_v11, %v3433_v37  ;;  %v3498_v6 = vpop.eup %3497 }
 0xe6b   :  { %v1631_v39 = vpop.xlane.xlu1 %1630  ;;  %v1745_v42 = vmul.f32 %v3498_v6, %v3486_v54 }
 0xe6c   :  { %3503 = vrcp.f32 %v1631_v39  ;;  %3316 = vmatprep.subr.bf16.mxu1 %v3315_v38 }
 0xe6e   :  { %v3500_v8 = vpop.eup %3499 }
 0xe6f   :  { %v2026_v13 = vpop.xlane.xlu1 %2025  ;;  %v1744_v41 = vmul.f32 %v3500_v8, %v3488_v1 }
 0xe70   :  { %3505 = vrcp.f32 %v2026_v13 }
 0xe71   :  { %3137 = vmatprep.mubr.msk.f32.mxu1 %vm346_vm12, %v1744_v41 }
 0xe72   :  { %3138 = vmatmul.mubr.msk.f32.vlgmr.msra.gmra.mrb[10].mxu1 %vm346_vm12, %v1745_v42  ;;  %v3502_v10 = vpop.eup %3501 }
 0xe73   :  { %3318 = vmatpush3.bf16.msra.mxu1 %v3315_v38  ;;  %v2023_v9 = vpop.xlane.xlu1 %2022  ;;  %v1638_v45 = vmul.f32 %v3502_v10, %v3490_v16  ;;  %v2325_v16 = vld [vmem:[#allocation8 + $0x30] sm:$0xff]  ;;  %v2461_v10 = vld [vmem:[#allocation10 + $0x28] sm:$0xff] }
 0xe74   :  { %3507 = vrcp.f32 %v2023_v9  ;;  %v3343_v40 = vpack.c.bf16 %v2326_v7, %v2325_v16  ;;  %v2460_v9 = vld [vmem:[#allocation10 + $0x20] sm:$0xff]  ;;  %v2555_v16 = vld [vmem:[#allocation11 + $0x30] sm:$0xff] }
 0xe75   :  { %v3359_v7 = vpack.c.bf16 %v2556_v20, %v2555_v16 }
 0xe76   :  { %v3504_v3 = vpop.eup %3503  ;;  %3344 = vmatprep.subr.bf16.mxu0 %v3343_v40 }
 0xe77   :  { %v3437_v43 = vpop.permute.xlu1 %3436  ;;  %v1637_v44 = vmul.f32 %v3504_v3, %v3492_v23  ;;  %3346 = vmatpush3.bf16.msra.mxu0 %v3343_v40  ;;  %v2462_v3 = vld [vmem:[#allocation10 + $0x30] sm:$0xff]  ;;  %v2879_v40 = vld [vmem:[%s4321_s9 + $0x1] ss:$0 sm:$0xff] }
 0xe78   :  { %v3439_v46 = vunpack.i.h.bf16 %v3437_v43  ;;  %v3438_v47 = vunpack.i.l.bf16 %v3437_v43  ;;  %v2463_v43 = vld [vmem:[#allocation10 + $0x38] sm:$0xff] }
 0xe79   :  { %3144 = vmatprep.mubr.msk.f32.mxu1 %vm346_vm12, %v1637_v44  ;;  %v2553_v44 = vld [vmem:[#allocation11 + $0x20] sm:$0xff] }
 0xe7a   :  { %v3325_v48 = vpack.c.bf16 %v3439_v46, %v3438_v47  ;;  %3145 = vmatmul.mubr.msk.f32.vlgmr.msra.gmra.mrb[10].mxu1 %vm346_vm12, %v1638_v45  ;;  %v3506_v49 = vpop.eup %3505  ;;  %v2554_v45 = vld [vmem:[#allocation11 + $0x28] sm:$0xff] }
 0xe7b   :  { %v2030_v19 = vmul.f32 %v3506_v49, %v3494_v24  ;;  %v3355_v46 = vpack.c.bf16 %v2554_v45, %v2553_v44 }
 0xe7c   :  { %3326 = vmatprep.subr.bf16.mxu1 %v3325_v48 }
 0xe7d   :  { %3328 = vmatpush3.bf16.msra.mxu1 %v3325_v48 }
 0xe7e   :  { %v3508_v50 = vpop.eup %3507  ;;  %3331 = vmatprep.subr.msk.bf16.mxu1 %vm3931_vm11, %v4154_v21 }
 0xe7f   :  { %v2029_v51 = vmul.f32 %v3508_v50, %v3496_v25 }
 0xe81   :  { %3158 = vmatprep.mubr.msk.f32.mxu1 %vm346_vm12, %v2029_v51 }
 0xe82   :  { %3159 = vmatmul.mubr.msk.f32.vlgmr.msra.gmra.mrb[10].mxu1 %vm346_vm12, %v2030_v19 }
 0xe83   :  { %3165 = vmatprep.mubr.msk.f32.mxu1 %vm171_vm0, %v2124_v52 }
 0xe86   :  { %3334 = vmatpush3.bf16.xpose.msk.msra.mxu1 %vm3931_vm11, %v4154_v21 }
 0xe8d   :  { %3166 = vmatmul.mubr.msk.f32.vlgmr.msra.gmra.mrb[12].mxu1 %vm171_vm0, %v2125_v15 }
 0xf60   :  { %v3167_v53 = vpop.f32.mrb[12].mxu1 }
 0xf61   :  { %v2204_v54 = vadd.f32 %v3167_v53, %v3967_v32  ;;  %v2198_v58 = vpop.f32.mrb[13].mxu1 }
 0xf62   :  { %v2199_v59 = vadd.f32 %v2198_v58, %v3969_v33 }
 0xf63   :  { %v2210_v63 = vsel %vm346_vm12, %v2204_v54, -inf }
 0xf64   :  { %2211 = vmax.xlane.f32.xlu0 %v2210_v63  ;;  %v2207_v62 = vsel %vm346_vm12, %v2199_v59, -inf }
 0xf65   :  { %2208 = vmax.xlane.f32.xlu1 %v2207_v62 }
 0xff1   :  { %v2212_v0 = vpop.xlane.xlu0 %2211 }
 0xff2   :  { %v2214_v26 = vsub.f32 %v2204_v54, %v2212_v0  ;;  %v2209_v21 = vpop.xlane.xlu1 %2208 }
 0xff3   :  { %v2213_v1 = vsub.f32 %v2199_v59, %v2209_v21  ;;  %v2877_v21 = vld [vmem:[%s4318_s6 + $0x1] ss:$0 sm:$0xff] }
 0xff4   :  { %v2217_v60 = vmul.f32 1.442695, %v2214_v26 }
 0xff5   :  { %v2215_v12 = vmul.f32 1.442695, %v2213_v1 }
 0xff6   :  { %3509 = vpow2.f32 %v2217_v60  ;;  %v2878_v60 = vld [vmem:[%s4319_s7 + $0x1] ss:$0 sm:$0xff] }
 0xff7   :  { %3511 = vpow2.f32 %v2215_v12 }
0x1000   :  { %v3510_v61 = vpop.eup %3509 }
0x1001   :  { %v3512_v2 = vpop.eup %3511  ;;  %v2222_v32 = vsel %vm346_vm12, %v3510_v61, 0.0 }
0x1002   :  { %2223 = vadd.xlane.f32.xlu0 %v2222_v32  ;;  %v2219_v33 = vsel %vm346_vm12, %v3512_v2, 0.0 }
0x1003   :  { %2220 = vadd.xlane.f32.xlu1 %v2219_v33 }
0x1014   :  { %3441 = vrot.lane.b32.xlu1 %v3440_v34, %s3699_s21 }
0x108f   :  { %v2224_v5 = vpop.xlane.xlu0 %2223 }
0x1090   :  { %3513 = vrcp.f32 %v2224_v5  ;;  %v2221_v22 = vpop.xlane.xlu1 %2220 }
0x1091   :  { %3515 = vrcp.f32 %v2221_v22 }
0x1094   :  { %v3442_v23 = vpop.permute.xlu1 %3441 }
0x1095   :  { %v3444_v17 = vunpack.i.h.bf16 %v3442_v23  ;;  %v3443_v18 = vunpack.i.l.bf16 %v3442_v23 }
0x1097   :  { %v3335_v24 = vpack.c.bf16 %v3444_v17, %v3443_v18 }
0x1099   :  { %3336 = vmatprep.subr.bf16.mxu1 %v3335_v24 }
0x109a   :  { %v3514_v35 = vpop.eup %3513  ;;  %3338 = vmatpush3.bf16.msra.mxu1 %v3335_v24 }
0x109b   :  { %v3516_v14 = vpop.eup %3515  ;;  %v2228_v27 = vmul.f32 %v3514_v35, %v3510_v61  ;;  %3356 = vmatprep.subr.bf16.mxu1 %v3355_v46  ;;  %v2882_v35 = vld [vmem:[%s4323_s11 + $0x1] ss:$0 sm:$0xff] }
0x109c   :  { %v2227_v34 = vmul.f32 %v3516_v14, %v3512_v2 }
0x109e   :  { %3172 = vmatprep.mubr.msk.f32.mxu1 %vm346_vm12, %v2227_v34 }
0x109f   :  { %3173 = vmatmul.mubr.msk.f32.vlgmr.msra.gmra.mrb[10].mxu1 %vm346_vm12, %v2228_v27 }
0x10a0   :  { %3358 = vmatpush3.bf16.msra.mxu1 %v3355_v46 }
0x10a1   :  { %3360 = vmatprep.subr.bf16.mxu1 %v3359_v7 }
0x10a4   :  { %3362 = vmatpush3.bf16.msra.mxu1 %v3359_v7 }
0x1172   :  { %v3174_v25 = vpop.f32.mrb[10].mxu1 }
0x1173   :  { %v2311_v28 = vpop.f32.mrb[11].mxu1 }
0x1174   :  { %3183 = vmatprep.mubr.msk.f32.mxu0 %vm171_vm0, %v2311_v28 }
0x1175   :  { %3184 = vmatmul.mubr.msk.f32.vlgmr.msra.gmra.mrb[16].mxu0 %vm171_vm0, %v3174_v25 }
0x1248   :  { %v3185_v30 = vpop.f32.mrb[16].mxu0 }
0x1249   :  { %v2410_v31 = vadd.f32 %v3185_v30, %v2874_v29  ;;  %v2404_v36 = vpop.f32.mrb[17].mxu0 }
0x124a   :  { %v2405_v11 = vadd.f32 %v2874_v29, %v2404_v36 }
0x124b   :  { %v2414_v37 = vadd.f32 %v2410_v31, %v4098_v57  ;;  %v3347_v57 = vpack.c.bf16 %v2461_v10, %v2460_v9 }
0x124c   :  { %v2413_v38 = vadd.f32 %v2405_v11, %v4096_v55  ;;  %v3351_v55 = vpack.c.bf16 %v2463_v43, %v2462_v3 }
0x124d   :  { %v2420_v39 = vsel %vm171_vm0, %v2414_v37, 0.0  ;;  %v2426_v41 = vmul.f32 %v2414_v37, %v2414_v37  ;;  %3348 = vmatprep.subr.bf16.mxu0 %v3347_v57 }
0x124e   :  { %2421 = vadd.xlane.f32.xlu0 %v2420_v39  ;;  %v2417_v6 = vsel %vm171_vm0, %v2413_v38, 0.0  ;;  %v2425_v8 = vmul.f32 %v2413_v38, %v2413_v38  ;;  %3350 = vmatpush3.bf16.msra.mxu0 %v3347_v57  ;;  %v2689_v39 = vld [vmem:[%s4326_s14] sm:$0xff] }
0x124f   :  { %v2430_v42 = vsel %vm171_vm0, %v2426_v41, 0.0  ;;  %3352 = vmatprep.subr.bf16.mxu0 %v3351_v55  ;;  %v2692_v41 = vld [vmem:[%s4326_s14 + $0x18] sm:$0xff] }
0x1250   :  { %v2427_v13 = vsel %vm171_vm0, %v2425_v8, 0.0  ;;  %v2691_v8 = vld [vmem:[%s4326_s14 + $0x10] sm:$0xff] }
0x1252   :  { %2418 = vadd.xlane.f32.xlu0 %v2417_v6  ;;  %3354 = vmatpush3.bf16.msra.mxu0 %v3351_v55  ;;  %v2690_v6 = vld [vmem:[%s4326_s14 + $0x8] sm:$0xff] }
0x1256   :  { %2428 = vadd.xlane.f32.xlu0 %v2427_v13  ;;  %v3363_v13 = vpack.c.bf16 %v2690_v6, %v2689_v39 }
0x1258   :  { %3364 = vmatprep.subr.bf16.mxu0 %v3363_v13 }
0x125a   :  { %2431 = vadd.xlane.f32.xlu0 %v2430_v42  ;;  %v3367_v42 = vpack.c.bf16 %v2692_v41, %v2691_v8 }
0x12db   :  { %v2422_v47 = vpop.xlane.xlu0 %2421 }
0x12dc   :  { %v2424_v51 = vmul.f32 0.03125, %v2422_v47 }
0x12de   :  { %v2436_v54 = vmul.f32 %v2424_v51, %v2424_v51  ;;  %v2440_v12 = vsub.f32 %v2414_v37, %v2424_v51 }
0x12df   :  { %v2419_v48 = vpop.xlane.xlu0 %2418 }
0x12e0   :  { %v2423_v49 = vmul.f32 0.03125, %v2419_v48 }
0x12e2   :  { %v2435_v19 = vmul.f32 %v2423_v49, %v2423_v49  ;;  %v2439_v0 = vsub.f32 %v2413_v38, %v2423_v49 }
0x12e3   :  { %v2429_v50 = vpop.xlane.xlu0 %2428 }
0x12e4   :  { %v2433_v52 = vmul.f32 0.03125, %v2429_v50 }
0x12e6   :  { %v2437_v15 = vsub.f32 %v2433_v52, %v2435_v19 }
0x12e7   :  { %v2432_v53 = vpop.xlane.xlu0 %2431 }
0x12e8   :  { %v2441_v58 = vadd.f32 1e-05, %v2437_v15  ;;  %v2434_v59 = vmul.f32 0.03125, %v2432_v53  ;;  %v2885_v15 = vld [vmem:[%s4324_s12 + $0x1] ss:$0 sm:$0xff]  ;;  %s3700_s12 = smov [#allocation13]  }
0x12e9   :  { %s2788_s0 = sshll.u32 %s3700_s12, 4  ;;  %s2789_s0 = int_to_ptr.vmem [resolvable:$true] %s2788_s0 }
0x12ea   :  { %3517 = vrsqrt.f32 %v2441_v58  ;;  %v2438_v63 = vsub.f32 %v2434_v59, %v2436_v54  ;;  %v2886_v54 = vld [vmem:[%s4325_s13 + $0x1] ss:$0 sm:$0xff]  ;;  %s3657_s13 = scalar_lea.vmem %s2789_s0, 256  ;;  %p3662_p7 = scmp.lt.s32.totalorder %s2789_s0, %s2789_s0 }
0x12eb   :  { %p3658_p6 = scmp.ne.s32.totalorder %s2789_s0, %s3657_s13  ;;  %p3663_p8 = scmp.lt.s32.totalorder %s3657_s13, %s3657_s13 }
0x12ec   :  { %v2442_v62 = vadd.f32 1e-05, %v2438_v63 }
0x12ed   :  { %p3664_p9 = por %p3663_p8, %p3662_p7 }
0x12ee   :  { %3519 = vrsqrt.f32 %v2442_v62 }
0x12ef   :  { %p3665_p10 = pnand %p3664_p9, %p3658_p6 }
0x12f4   :  { %v3518_v26 = vpop.eup %3517 }
0x12f5   :  { %v2445_v1 = vmul.f32 %v3518_v26, %v2439_v0 }
0x12f7   :  { %v2451_v61 = vmul.f32 %v2877_v21, %v2445_v1  ;;  %v2887_v1 = vld [vmem:[%s4327_s15] ss:$0 sm:$0xff] }
0x12f8   :  { %v3520_v2 = vpop.eup %3519 }
0x12f9   :  { %v2446_v32 = vmul.f32 %v3520_v2, %v2440_v12  ;;  %v2457_v33 = vadd.f32 %v2878_v60, %v2451_v61 }
0x12fb   :  { %v2452_v4 = vmul.f32 %v2877_v21, %v2446_v32  ;;  %3194 = vmatprep.mubr.msk.f32.mxu0 %vm171_vm0, %v2457_v33 }
0x12fd   :  { %v2458_v56 = vadd.f32 %v2878_v60, %v2452_v4 }
0x12ff   :  { %3195 = vmatmul.mubr.msk.f32.vlgmr.msra.gmra.mrb[18].mxu0 %vm171_vm0, %v2458_v56 }
0x1300   :  { %3366 = vmatpush3.bf16.msra.mxu0 %v3363_v13 }
0x1301   :  { %3368 = vmatprep.subr.bf16.mxu0 %v3367_v42 }
0x1304   :  { %3370 = vmatpush3.bf16.msra.mxu0 %v3367_v42 }
0x13d2   :  { %v3196_v5 = vpop.f32.mrb[18].mxu0 }
0x13d3   :  { %v2547_v22 = vadd.f32 %v3196_v5, %v2879_v40  ;;  %v2541_v23 = vpop.f32.mrb[19].mxu0 }
0x13d4   :  { %v2542_v17 = vadd.f32 %v2879_v40, %v2541_v23 }
0x13d5   :  { %v2551_v24 = vmax.f32 %v2547_v22, 0.0 }
0x13d6   :  { %v2550_v18 = vmax.f32 %v2542_v17, 0.0 }
0x13d8   :  { %3205 = vmatprep.mubr.msk.f32.mxu1 %vm171_vm0, %v2550_v18 }
0x13d9   :  { %3206 = vmatmul.mubr.msk.f32.vlgmr.msra.gmra.mrb[14].mxu1 %vm171_vm0, %v2551_v24 }
0x14ac   :  { %v3207_v14 = vpop.f32.mrb[14].mxu1 }
0x14ad   :  { %v2640_v34 = vadd.f32 %v3207_v14, %v2882_v35  ;;  %v2634_v27 = vpop.f32.mrb[15].mxu1 }
0x14ae   :  { %v2635_v25 = vadd.f32 %v2882_v35, %v2634_v27 }
0x14af   :  { %v2644_v28 = vadd.f32 %v2640_v34, %v2458_v56 }
0x14b0   :  { %v2643_v29 = vadd.f32 %v2635_v25, %v2457_v33 }
0x14b1   :  { %v2650_v30 = vsel %vm171_vm0, %v2644_v28, 0.0  ;;  %v2656_v37 = vmul.f32 %v2644_v28, %v2644_v28 }
0x14b2   :  { %2651 = vadd.xlane.f32.xlu0 %v2650_v30  ;;  %v2647_v31 = vsel %vm171_vm0, %v2643_v29, 0.0  ;;  %v2655_v36 = vmul.f32 %v2643_v29, %v2643_v29 }
0x14b3   :  { %2648 = vadd.xlane.f32.xlu1 %v2647_v31  ;;  %v2660_v38 = vsel %vm171_vm0, %v2656_v37, 0.0 }
0x14b4   :  { %v2657_v11 = vsel %vm171_vm0, %v2655_v36, 0.0 }
0x14b6   :  { %2658 = vadd.xlane.f32.xlu0 %v2657_v11 }
0x14ba   :  { %2661 = vadd.xlane.f32.xlu0 %v2660_v38 }
0x153f   :  { %v2652_v9 = vpop.xlane.xlu0 %2651 }
0x1540   :  { %v2649_v10 = vpop.xlane.xlu1 %2648  ;;  %v2654_v55 = vmul.f32 0.03125, %v2652_v9 }
0x1541   :  { %v2653_v3 = vmul.f32 0.03125, %v2649_v10 }
0x1542   :  { %v2666_v47 = vmul.f32 %v2654_v55, %v2654_v55  ;;  %v2670_v58 = vsub.f32 %v2644_v28, %v2654_v55 }
0x1543   :  { %v2665_v57 = vmul.f32 %v2653_v3, %v2653_v3  ;;  %v2659_v43 = vpop.xlane.xlu0 %2658  ;;  %v2669_v19 = vsub.f32 %v2643_v29, %v2653_v3 }
0x1544   :  { %v2663_v44 = vmul.f32 0.03125, %v2659_v43 }
0x1546   :  { %v2667_v45 = vsub.f32 %v2663_v44, %v2665_v57 }
0x1547   :  { %v2662_v46 = vpop.xlane.xlu0 %2661 }
0x1548   :  { %v2671_v48 = vadd.f32 1e-05, %v2667_v45  ;;  %v2664_v49 = vmul.f32 0.03125, %v2662_v46 }
0x154a   :  { %3521 = vrsqrt.f32 %v2671_v48  ;;  %v2668_v50 = vsub.f32 %v2664_v49, %v2666_v47 }
0x154c   :  { %v2672_v51 = vadd.f32 1e-05, %v2668_v50 }
0x154e   :  { %3523 = vrsqrt.f32 %v2672_v51 }
0x1554   :  { %v3522_v52 = vpop.eup %3521 }
0x1555   :  { %v2675_v53 = vmul.f32 %v3522_v52, %v2669_v19 }
0x1557   :  { %v2681_v59 = vmul.f32 %v2885_v15, %v2675_v53 }
0x1558   :  { %v3524_v63 = vpop.eup %3523 }
0x1559   :  { %v2676_v62 = vmul.f32 %v3524_v63, %v2670_v58  ;;  %v2687_v0 = vadd.f32 %v2886_v54, %v2681_v59 }
0x155b   :  { %v2682_v26 = vmul.f32 %v2885_v15, %v2676_v62  ;;  %3216 = vmatprep.mubr.msk.f32.mxu0 %vm171_vm0, %v2687_v0 }
0x155d   :  { %v2688_v21 = vadd.f32 %v2886_v54, %v2682_v26 }
0x155f   :  { %3217 = vmatmul.mubr.msk.f32.vlgmr.msra.gmra.mrb[20].mxu0 %vm171_vm0, %v2688_v21 }
0x1632   :  { %v3218_v60 = vpop.f32.mrb[20].mxu0 }
0x1633   :  { %v2778_v12 = vadd.f32 %v3218_v60, %v2887_v1  ;;  %v2772_v61 = vpop.f32.mrb[21].mxu0 }
0x1634   :  { %v2773_v2 = vadd.f32 %v2887_v1, %v2772_v61 }
0x1635   :  { %2782 = vst [vmem:[#allocation13 + $0x8] sm:$0xff] %v2778_v12 }
0x1636   :  { %2781 = vst [vmem:[#allocation13] sm:$0xff] %v2773_v2 }
0x1637   :  { %3668 = shalt.err (!%p3665_p10)
}
0x1638   :  { %s4336_s24 = sld [smem:[#allocation20_spill]] }
0x163e   :  { %s3669_s15 = scalar_lea.hbm %s4336_s24, 256 }
0x163f   :  { %p3670_p11 = scmp.ne.s32.totalorder %s4336_s24, %s3669_s15  ;;  %p3673_p12 = scmp.lt.u32.totalorder %s3669_s15, %s4336_s24 }
0x1641   :  { %p3675_p13 = pnand %p3673_p12, %p3670_p11 }
0x1643   :  { %3678 = shalt.err (!%p3675_p13)
}
0x1644   :  { %2794 = dma.vmem_to_hbm [thread:$0]  %s2789_s0, 256, %s4336_s24, [#allocation4], %s3691_s18, %s3691_s18, %s3692_s19  }
0x1645   :  { %3687 = dma.done.wait [#allocation4], 256  }
0x1646   :  { %3688 = vsyncadd [#allocation4], 4294967040 }
0x1647   :  { %2798 = vsyncpa [#allocation3], 1 }
0x1648   :  { %2799 = vsyncpa [#allocation6], 1 }
0x1649   :  { %2800 = vsyncpa [#allocation9], 1 }
0x164a   :  { %2801 = vsyncpa [#allocation12], 1 }
0x164b   :  { %2802 = vsyncpa [#allocation4], 1 }

</bundles_post_ra>
